<compile_context>
chip_gen: v5e
topology: v5e:2x2
jax: 0.10.0
libtpu: 0.0.40
codegen_flags: <defaults>
</compile_context>

<pallas_src>
import functools
import math

import jax
import jax.numpy as jnp
import numpy as np
from jax.experimental import pallas as pl
from jax.experimental.pallas import tpu as pltpu


def _round_up(x, m):
    return (x + m - 1) // m * m


HP = 128  # padded head columns = one full lane group


# --------------------------------- kernel ------------------------------------

def _node_attn_kernel(start_ref, ntiles_ref,
                      q_ref, kv_ref, ke_ref, idx_ref, valid_ref,
                      wq_ref, wv_ref, we_ref, b1_ref, b3_ref, w2_ref, exp_ref,
                      out_ref,
                      m_sc, acc_sc,
                      *, node_tile, c_dim, mxu_dtype):
    f32 = jnp.float32
    n_blk = pl.program_id(0)
    e_step = pl.program_id(1)

    @pl.when(e_step == 0)
    def _init():
        m_sc[...] = jnp.full(m_sc.shape, -1e30, m_sc.dtype)
        acc_sc[...] = jnp.zeros(acc_sc.shape, acc_sc.dtype)

    # Only the edge tiles belonging to this node block are processed; tiles
    # beyond the block's range (index_map clamps to the last real tile, so no
    # extra DMA is issued) are skipped entirely.
    @pl.when(e_step < ntiles_ref[n_blk])
    def _step():
        q = q_ref[...]
        kv = kv_ref[...]
        ke = ke_ref[...]

        # w1(cat[q,k_v,k_e]) and w3(cat[k_v,k_e]) share the k_v/k_e operands:
        # wv = [w1v | w3v], we = [w1e | w3e]  ->  3 matmuls instead of 5.
        hq = jnp.dot(q, wq_ref[...], preferred_element_type=f32)      # [et, C]
        hv = jnp.dot(kv, wv_ref[...], preferred_element_type=f32)     # [et, 2C]
        he = jnp.dot(ke, we_ref[...], preferred_element_type=f32)     # [et, 2C]

        h = hq + hv[:, :c_dim] + he[:, :c_dim] + b1_ref[...]
        h = jnp.where(h >= 0.0, h, 0.01 * h)                 # leaky_relu(0.01)
        v = hv[:, c_dim:] + he[:, c_dim:] + b3_ref[...]               # [et, C]

        # head-batched logits via block-diagonal W2 (heads padded to 128 lanes)
        a = jnp.dot(h.astype(mxu_dtype), w2_ref[...],
                    preferred_element_type=f32)                       # [et, 128]
        # mask padded edge rows so they cannot move the running max
        a = a + (valid_ref[...] - 1.0) * 1e30

        # Online segment softmax with a per-head running max.  The offset is
        # uniform within every segment, so the normalized result is exact.
        m_old = m_sc[...]                                             # [1, 128]
        m_cur = jnp.max(a, axis=0, keepdims=True)
        m_new = jnp.maximum(m_old, m_cur)
        changed = jnp.max(jnp.where(m_cur > m_old, 1.0, 0.0)) > 0.0

        exp_m = exp_ref[...]                                          # [128, C]

        # Rescale the resident accumulator only when the running max moved.
        @pl.when(changed)
        def _rescale():
            scale = jnp.exp(m_old - m_new)                            # [1, 128]
            scale8 = jnp.broadcast_to(scale, (8, HP)).astype(mxu_dtype)
            scale_c = jnp.dot(scale8, exp_m,
                              preferred_element_type=f32)[:1]         # [1, C]
            acc_sc[...] = acc_sc[...] * jnp.concatenate(
                [scale_c, scale], axis=-1)

        m_sc[...] = m_new

        p = jnp.exp(a - m_new)                                        # [et, 128]
        p_c = jnp.dot(p.astype(mxu_dtype), exp_m,
                      preferred_element_type=f32)                     # [et, C]

        # one-hot scatter rows for this node block (exact 0/1 in bf16)
        idx = idx_ref[...]                                            # [1, et]
        node_ids = (jax.lax.broadcasted_iota(jnp.int32, (node_tile, 1), 0)
                    + n_blk * node_tile)
        onehot = (node_ids == idx).astype(mxu_dtype)                  # [nt, et]

        # Fused numerator+denominator scatter: ONE [nt,et]x[et,C+128] matmul.
        scat = jnp.concatenate([p_c * v, p], axis=-1).astype(mxu_dtype)
        acc_sc[...] = acc_sc[...] + jnp.dot(onehot, scat,
                                            preferred_element_type=f32)

    @pl.when(e_step == pl.num_programs(1) - 1)
    def _finalize():
        acc = acc_sc[...]                                             # [nt, C+128]
        # expand the per-head denominator (last 128 lanes) back to channels
        l_c = jnp.dot(acc[:, c_dim:].astype(mxu_dtype), exp_ref[...],
                      preferred_element_type=f32)                     # [nt, C]
        out_ref[...] = (acc[:, :c_dim] / (l_c + 1e-16)).astype(out_ref.dtype)


# --------------------------------- wrapper ------------------------------------

def node_attn_forward(params, q, k_v, k_e, index, nnode, *,
                      edge_tile=1024, num_node_blocks=1,
                      mxu_dtype=jnp.bfloat16, vmem_limit_mb=64):
    """NodeAttn forward (flash-style online segment softmax).

    mxu_dtype=jnp.bfloat16 (default) uses bf16 MXU operands with f32
    accumulation; pass jnp.float32 for bit-strict checks.
    On v7x set num_node_blocks>=2 (node axis is "parallel"); with the sorted
    per-block edge ranges the projections are NOT duplicated across cores.
    v6e: vmem_limit_mb=64-96, edge_tile=1024-2048.  v7x: vmem_limit_mb<=48.
    """
    n_edges, emb_dim = q.shape
    num_heads = params["num_heads"]
    assert emb_dim % num_heads == 0 and num_heads <= HP
    f32 = jnp.float32
    head_dim = emb_dim // num_heads

    # padded sizes: lane-dense features, sublane-aligned edge/node tiles
    C = _round_up(emb_dim, 128)
    et = min(_round_up(edge_tile, 8), _round_up(n_edges, 8))
    N = _round_up(n_edges, et)
    total_tiles = N // et
    nt = _round_up(nnode, 8 * num_node_blocks) // num_node_blocks
    NN = nt * num_node_blocks

    def pad2(x, rows, cols):
        x = x.astype(f32)
        return jnp.pad(x, ((0, rows - x.shape[0]), (0, cols - x.shape[1])))

    # ---- host-side edge sort by destination node: every node block's edges
    #      become a contiguous tile range (data-dependent edge tiling) ----
    idx_p = jnp.concatenate([index.astype(jnp.int32),
                             jnp.full((N - n_edges,), NN, jnp.int32)])
    valid_p = jnp.concatenate([jnp.ones((n_edges,), f32),
                               jnp.zeros((N - n_edges,), f32)])
    order = jnp.argsort(idx_p)
    idx_s = idx_p[order]
    valid_s = valid_p[order].reshape(N, 1)
    idx_row = idx_s.reshape(1, N)
    q_s = pad2(q, N, C).astype(mxu_dtype)[order]
    kv_s = pad2(k_v, N, C).astype(mxu_dtype)[order]
    ke_s = pad2(k_e, N, C).astype(mxu_dtype)[order]

    bounds = jnp.arange(num_node_blocks + 1, dtype=jnp.int32) * nt
    edge_lo = jnp.searchsorted(idx_s, bounds[:-1], side="left").astype(jnp.int32)
    edge_hi = jnp.searchsorted(idx_s, bounds[1:], side="left").astype(jnp.int32)
    start_tile = jnp.minimum(edge_lo // et, total_tiles - 1).astype(jnp.int32)
    end_tile = (edge_hi + et - 1) // et
    ntiles = jnp.clip(end_tile - start_tile, 0, total_tiles).astype(jnp.int32)

    # ---- weights: pre-transposed, cat() folded into per-input blocks ----
    w1t = params["w1_w"].T.astype(f32)           # [3E, E]
    w3t = params["w3_w"].T.astype(f32)           # [2E, E]
    wq = pad2(w1t[:emb_dim], C, C).astype(mxu_dtype)
    wv = jnp.concatenate([pad2(w1t[emb_dim:2 * emb_dim], C, C),
                          pad2(w3t[:emb_dim], C, C)], axis=1).astype(mxu_dtype)
    we = jnp.concatenate([pad2(w1t[2 * emb_dim:], C, C),
                          pad2(w3t[emb_dim:], C, C)], axis=1).astype(mxu_dtype)
    b1 = pad2(params["w1_b"].reshape(1, emb_dim), 1, C)
    b3 = pad2(params["w3_b"].reshape(1, emb_dim), 1, C)

    # block-diagonal W2 ([C, 128]) for head-batched logits and the 0/1
    # head->channel expander ([128, C]); both exact in bf16.
    w2_bd = jnp.zeros((C, HP), f32)
    expander = jnp.zeros((HP, C), f32)
    for h in range(num_heads):
        lo = h * head_dim
        w2_bd = w2_bd.at[lo:lo + head_dim, h].set(params["w2"][h].astype(f32))
        expander = expander.at[h, lo:lo + head_dim].set(1.0)
    w2_bd = w2_bd.astype(mxu_dtype)
    expander = expander.astype(mxu_dtype)

    # ---- specs: edge tiles are picked per node block via scalar prefetch ----
    def edge_map(n, e, start, ntls):
        t = start[n] + jnp.minimum(e, jnp.maximum(ntls[n] - 1, 0))
        return (t, 0)

    def row_map(n, e, start, ntls):
        t = start[n] + jnp.minimum(e, jnp.maximum(ntls[n] - 1, 0))
        return (0, t)

    const_map = lambda n, e, start, ntls: (0, 0)
    out_map = lambda n, e, start, ntls: (n, 0)

    kernel = functools.partial(_node_attn_kernel, node_tile=nt, c_dim=C,
                               mxu_dtype=mxu_dtype)

    out = pl.pallas_call(
        kernel,
        out_shape=jax.ShapeDtypeStruct((NN, C), jnp.float32),
        grid_spec=pltpu.PrefetchScalarGridSpec(
            num_scalar_prefetch=2,
            grid=(num_node_blocks, total_tiles),
            in_specs=[
                pl.BlockSpec((et, C), edge_map),       # q (sorted)
                pl.BlockSpec((et, C), edge_map),       # k_v (sorted)
                pl.BlockSpec((et, C), edge_map),       # k_e (sorted)
                pl.BlockSpec((1, et), row_map),        # edge->node index row
                pl.BlockSpec((et, 1), edge_map),       # valid-edge mask column
                pl.BlockSpec((C, C), const_map),       # wq
                pl.BlockSpec((C, 2 * C), const_map),   # wv = [w1v | w3v]
                pl.BlockSpec((C, 2 * C), const_map),   # we = [w1e | w3e]
                pl.BlockSpec((1, C), const_map),       # b1
                pl.BlockSpec((1, C), const_map),       # b3
                pl.BlockSpec((C, HP), const_map),      # block-diagonal w2
                pl.BlockSpec((HP, C), const_map),      # head->channel expander
            ],
            out_specs=pl.BlockSpec((nt, C), out_map),
            scratch_shapes=[
                pltpu.VMEM((1, HP), jnp.float32),        # running per-head max
                pltpu.VMEM((nt, C + HP), jnp.float32),   # fused num+den accum
            ]),
        compiler_params=pltpu.CompilerParams(
            dimension_semantics=("parallel", "arbitrary"),
            vmem_limit_bytes=vmem_limit_mb * 1024 * 1024),
    )(start_tile, ntiles, q_s, kv_s, ke_s, idx_row, valid_s,
      wq, wv, we, b1, b3, w2_bd, expander)

    return out[:nnode, :emb_dim]


# ------------------------------ parameter init --------------------------------

def _xavier_uniform(key, shape, fan_in, fan_out, gain):
    bound = gain * math.sqrt(6.0 / (fan_in + fan_out))
    return jax.random.uniform(key, shape, jnp.float32, -bound, bound)


def init_params(key, emb_dim, num_heads):
    head_dim = emb_dim // num_heads
    gain = 1.0 / math.sqrt(2.0)
    k1, k2, k3, k4, k5 = jax.random.split(key, 5)
    w1_w = _xavier_uniform(k1, (emb_dim, 3 * emb_dim), 3 * emb_dim, emb_dim, gain)
    b1_bound = 1.0 / math.sqrt(3 * emb_dim)
    w1_b = jax.random.uniform(k2, (emb_dim,), jnp.float32, -b1_bound, b1_bound)
    w2 = _xavier_uniform(k3, (num_heads, head_dim), head_dim, num_heads, gain)
    w3_w = _xavier_uniform(k4, (emb_dim, 2 * emb_dim), 2 * emb_dim, emb_dim, gain)
    b3_bound = 1.0 / math.sqrt(2 * emb_dim)
    w3_b = jax.random.uniform(k5, (emb_dim,), jnp.float32, -b3_bound, b3_bound)
    return dict(num_heads=num_heads, w1_w=w1_w, w1_b=w1_b, w2=w2,
                w3_w=w3_w, w3_b=w3_b)


# ----------------------------- pure-JAX reference ------------------------------

def ref_forward(params, q, k_v, k_e, index, nnode):
    num_heads = params["num_heads"]
    emb_dim = q.shape[1]
    head_dim = emb_dim // num_heads
    x = jnp.concatenate([q, k_v, k_e], axis=1) @ params["w1_w"].T + params["w1_b"]
    x = jnp.where(x >= 0.0, x, 0.01 * x).reshape(-1, num_heads, head_dim)
    a = jnp.einsum("nhc,hc->nh", x, params["w2"])
    seg_max = jax.ops.segment_max(a, index, num_segments=nnode)
    seg_max = jnp.where(jnp.isfinite(seg_max), seg_max, 0.0)
    e = jnp.exp(a - seg_max[index])
    seg_sum = jax.ops.segment_sum(e, index, num_segments=nnode) + 1e-16
    attn = e / seg_sum[index]
    v = (jnp.concatenate([k_v, k_e], axis=1) @ params["w3_w"].T
         + params["w3_b"]).reshape(-1, num_heads, head_dim)
    out = (attn[..., None] * v).reshape(-1, emb_dim)
    return jax.ops.segment_sum(out, index, num_segments=nnode)


# ----------------------------------- test --------------------------------------

def _make_inputs(key, emb_dim, num_heads, n_edges, nnode):
    kp, kq, kkv, kke, ki = jax.random.split(key, 5)
    params = init_params(kp, emb_dim, num_heads)
    q = jax.random.normal(kq, (n_edges, emb_dim), jnp.float32)
    k_v = jax.random.normal(kkv, (n_edges, emb_dim), jnp.float32)
    k_e = jax.random.normal(kke, (n_edges, emb_dim), jnp.float32)
    index = jax.random.randint(ki, (n_edges,), 0, nnode, jnp.int32)
    return params, q, k_v, k_e, index


if __name__ == "__main__":
    key = jax.random.PRNGKey(0)
    k_small, k_big = jax.random.split(key, 2)

    # --- small config: single edge tile / node block; strict f32 + default bf16
    emb_dim, num_heads, n_edges, nnode = 32, 4, 16, 8
    params, q, k_v, k_e, index = _make_inputs(k_small, emb_dim, num_heads,
                                              n_edges, nnode)
    ref = ref_forward(params, q, k_v, k_e, index, nnode)

    out_f32 = node_attn_forward(params, q, k_v, k_e, index, nnode,
                                mxu_dtype=jnp.float32)
    out_f32 = jax.block_until_ready(out_f32)
    np.testing.assert_allclose(np.asarray(out_f32), np.asarray(ref),
                               rtol=1e-4, atol=1e-4)

    out_bf16 = node_attn_forward(params, q, k_v, k_e, index, nnode)  # bf16 default
    out_bf16 = jax.block_until_ready(out_bf16)
    np.testing.assert_allclose(np.asarray(out_bf16), np.asarray(ref),
                               rtol=1e-1, atol=5e-2)

    # --- larger config: multiple edge tiles + 2 node blocks (sorted per-block
    #     edge ranges, online rescale guard, megacore-style node split) ---
    emb_dim, num_heads, n_edges, nnode = 64, 8, 600, 40
    params, q, k_v, k_e, index = _make_inputs(k_big, emb_dim, num_heads,
                                              n_edges, nnode)
    ref = ref_forward(params, q, k_v, k_e, index, nnode)

    out_tiled = node_attn_forward(params, q, k_v, k_e, index, nnode,
                                  edge_tile=128, num_node_blocks=2,
                                  mxu_dtype=jnp.float32)
    out_tiled = jax.block_until_ready(out_tiled)
    np.testing.assert_allclose(np.asarray(out_tiled), np.asarray(ref),
                               rtol=1e-4, atol=1e-4)

    # default settings (bf16, single node block, large edge tile)
    out_def = node_attn_forward(params, q, k_v, k_e, index, nnode)
    out_def = jax.block_until_ready(out_def)
    np.testing.assert_allclose(np.asarray(out_def), np.asarray(ref),
                               rtol=2e-1, atol=1e-1)

    print("KERNEL_OK")
</pallas_src>

<mosaic_0001>
module attributes {stable_mosaic.version = 11 : i64} {
  func.func @_node_attn_kernel(%arg0: i32, %arg1: i32, %arg2: memref<1xi32, #tpu.memory_space<smem>>, %arg3: memref<1xi32, #tpu.memory_space<smem>>, %arg4: memref<16x128xf32, #tpu.memory_space<vmem>>, %arg5: memref<16x128xf32, #tpu.memory_space<vmem>>, %arg6: memref<16x128xf32, #tpu.memory_space<vmem>>, %arg7: memref<1x16xi32, #tpu.memory_space<vmem>>, %arg8: memref<16x1xf32, #tpu.memory_space<vmem>>, %arg9: memref<128x128xf32, #tpu.memory_space<vmem>>, %arg10: memref<128x256xf32, #tpu.memory_space<vmem>>, %arg11: memref<128x256xf32, #tpu.memory_space<vmem>>, %arg12: memref<1x128xf32, #tpu.memory_space<vmem>>, %arg13: memref<1x128xf32, #tpu.memory_space<vmem>>, %arg14: memref<128x128xf32, #tpu.memory_space<vmem>>, %arg15: memref<128x128xf32, #tpu.memory_space<vmem>>, %arg16: memref<8x128xf32, #tpu.memory_space<vmem>>, %arg17: memref<1x128xf32, #tpu.memory_space<vmem>>, %arg18: memref<8x256xf32, #tpu.memory_space<vmem>>) attributes {dimension_semantics = [#tpu.dimension_semantics<parallel>, #tpu.dimension_semantics<arbitrary>], iteration_bounds = array<i64: 1, 1>, scalar_prefetch = 2 : i64, scratch_operands = 2 : i64, tpu.core_type = #tpu.core_type<tc>, window_params = [{transform_indices = @transform_0, window_bounds = array<i64: 16, 128>}, {transform_indices = @transform_1, window_bounds = array<i64: 16, 128>}, {transform_indices = @transform_2, window_bounds = array<i64: 16, 128>}, {transform_indices = @transform_3, window_bounds = array<i64: 1, 16>}, {transform_indices = @transform_4, window_bounds = array<i64: 16, 1>}, {pipeline_mode = #tpu.pipeline_mode<synchronous>, transform_indices = @transform_5, window_bounds = array<i64: 128, 128>}, {pipeline_mode = #tpu.pipeline_mode<synchronous>, transform_indices = @transform_6, window_bounds = array<i64: 128, 256>}, {pipeline_mode = #tpu.pipeline_mode<synchronous>, transform_indices = @transform_7, window_bounds = array<i64: 128, 256>}, {pipeline_mode = #tpu.pipeline_mode<synchronous>, transform_indices = @transform_8, window_bounds = array<i64: 1, 128>}, {pipeline_mode = #tpu.pipeline_mode<synchronous>, transform_indices = @transform_9, window_bounds = array<i64: 1, 128>}, {pipeline_mode = #tpu.pipeline_mode<synchronous>, transform_indices = @transform_10, window_bounds = array<i64: 128, 128>}, {pipeline_mode = #tpu.pipeline_mode<synchronous>, transform_indices = @transform_11, window_bounds = array<i64: 128, 128>}, {transform_indices = @transform_12, window_bounds = array<i64: 8, 128>}]} {
    %c0_i32 = arith.constant 0 : i32
    %0 = arith.cmpi eq, %arg1, %c0_i32 : i32
    %1 = arith.extui %0 : i1 to i32
    %c0_i32_0 = arith.constant 0 : i32
    %2 = arith.cmpi ne, %1, %c0_i32_0 : i32
    scf.if %2 {
      %cst = arith.constant -1.000000e+30 : f32
      %11 = vector.broadcast %cst : f32 to vector<1x128xf32>
      %c0 = arith.constant 0 : index
      %c0_4 = arith.constant 0 : index
      %12 = vector.load %arg17[%c0, %c0_4] : memref<1x128xf32, #tpu.memory_space<vmem>>, vector<1x128xf32>
      tpu.vector_store %arg17[%c0, %c0_4], %11 {strides = array<i32>} : memref<1x128xf32, #tpu.memory_space<vmem>>, vector<1x128xf32>,
      %cst_5 = arith.constant 0.000000e+00 : f32
      %13 = vector.broadcast %cst_5 : f32 to vector<8x256xf32>
      %c0_6 = arith.constant 0 : index
      %c0_7 = arith.constant 0 : index
      %14 = vector.load %arg18[%c0_6, %c0_7] : memref<8x256xf32, #tpu.memory_space<vmem>>, vector<8x256xf32>
      tpu.vector_store %arg18[%c0_6, %c0_7], %13 {strides = array<i32>} : memref<8x256xf32, #tpu.memory_space<vmem>>, vector<8x256xf32>,
    } else {
    }
    %3 = arith.index_cast %arg0 : i32 to index
    %4 = memref.load %arg3[%3] : memref<1xi32, #tpu.memory_space<smem>>
    %5 = arith.cmpi slt, %arg1, %4 : i32
    %6 = arith.extui %5 : i1 to i32
    %c0_i32_1 = arith.constant 0 : i32
    %7 = arith.cmpi ne, %6, %c0_i32_1 : i32
    scf.if %7 {
      %c0 = arith.constant 0 : index
      %c0_4 = arith.constant 0 : index
      %11 = vector.load %arg4[%c0, %c0_4] : memref<16x128xf32, #tpu.memory_space<vmem>>, vector<16x128xf32>
      %c0_5 = arith.constant 0 : index
      %c0_6 = arith.constant 0 : index
      %12 = vector.load %arg5[%c0_5, %c0_6] : memref<16x128xf32, #tpu.memory_space<vmem>>, vector<16x128xf32>
      %c0_7 = arith.constant 0 : index
      %c0_8 = arith.constant 0 : index
      %13 = vector.load %arg6[%c0_7, %c0_8] : memref<16x128xf32, #tpu.memory_space<vmem>>, vector<16x128xf32>
      %c0_9 = arith.constant 0 : index
      %c0_10 = arith.constant 0 : index
      %14 = vector.load %arg9[%c0_9, %c0_10] : memref<128x128xf32, #tpu.memory_space<vmem>>, vector<128x128xf32>
      %cst = arith.constant dense<0.000000e+00> : vector<16x128xf32>
      %15 = tpu.matmul %11, %14, %cst {dimension_numbers = #tpu.dot_dimension_numbers<[1], [0], [0], [1], [0, 0, 1, 1], [], []>} : vector<16x128xf32>, vector<128x128xf32>, vector<16x128xf32> -> vector<16x128xf32>
      %c0_11 = arith.constant 0 : index
      %c0_12 = arith.constant 0 : index
      %16 = vector.load %arg10[%c0_11, %c0_12] : memref<128x256xf32, #tpu.memory_space<vmem>>, vector<128x256xf32>
      %cst_13 = arith.constant dense<0.000000e+00> : vector<16x256xf32>
      %17 = tpu.matmul %12, %16, %cst_13 {dimension_numbers = #tpu.dot_dimension_numbers<[1], [0], [0], [1], [0, 0, 1, 1], [], []>} : vector<16x128xf32>, vector<128x256xf32>, vector<16x256xf32> -> vector<16x256xf32>
      %c0_14 = arith.constant 0 : index
      %c0_15 = arith.constant 0 : index
      %18 = vector.load %arg11[%c0_14, %c0_15] : memref<128x256xf32, #tpu.memory_space<vmem>>, vector<128x256xf32>
      %cst_16 = arith.constant dense<0.000000e+00> : vector<16x256xf32>
      %19 = tpu.matmul %13, %18, %cst_16 {dimension_numbers = #tpu.dot_dimension_numbers<[1], [0], [0], [1], [0, 0, 1, 1], [], []>} : vector<16x128xf32>, vector<128x256xf32>, vector<16x256xf32> -> vector<16x256xf32>
      %20 = vector.extract_strided_slice %17 {offsets = [0, 0], sizes = [16, 128], strides = [1, 1]} : vector<16x256xf32> to vector<16x128xf32>
      %21 = arith.addf %15, %20 : vector<16x128xf32>
      %22 = vector.extract_strided_slice %19 {offsets = [0, 0], sizes = [16, 128], strides = [1, 1]} : vector<16x256xf32> to vector<16x128xf32>
      %23 = arith.addf %21, %22 : vector<16x128xf32>
      %c0_17 = arith.constant 0 : index
      %c0_18 = arith.constant 0 : index
      %24 = vector.load %arg12[%c0_17, %c0_18] : memref<1x128xf32, #tpu.memory_space<vmem>>, vector<1x128xf32>
      %25 = vector.broadcast %24 : vector<1x128xf32> to vector<16x128xf32>
      %26 = arith.addf %23, %25 : vector<16x128xf32>
      %cst_19 = arith.constant 0.000000e+00 : f32
      %27 = vector.broadcast %cst_19 : f32 to vector<16x128xf32>
      %28 = arith.cmpf oge, %26, %27 : vector<16x128xf32>
      %cst_20 = arith.constant 0.00999999977 : f32
      %29 = vector.broadcast %cst_20 : f32 to vector<16x128xf32>
      %30 = arith.mulf %29, %26 : vector<16x128xf32>
      %31 = arith.select %28, %26, %30 : vector<16x128xi1>, vector<16x128xf32>
      %32 = vector.extract_strided_slice %17 {offsets = [0, 128], sizes = [16, 128], strides = [1, 1]} : vector<16x256xf32> to vector<16x128xf32>
      %33 = vector.extract_strided_slice %19 {offsets = [0, 128], sizes = [16, 128], strides = [1, 1]} : vector<16x256xf32> to vector<16x128xf32>
      %34 = arith.addf %32, %33 : vector<16x128xf32>
      %c0_21 = arith.constant 0 : index
      %c0_22 = arith.constant 0 : index
      %35 = vector.load %arg13[%c0_21, %c0_22] : memref<1x128xf32, #tpu.memory_space<vmem>>, vector<1x128xf32>
      %36 = vector.broadcast %35 : vector<1x128xf32> to vector<16x128xf32>
      %37 = arith.addf %34, %36 : vector<16x128xf32>
      %c0_23 = arith.constant 0 : index
      %c0_24 = arith.constant 0 : index
      %38 = vector.load %arg14[%c0_23, %c0_24] : memref<128x128xf32, #tpu.memory_space<vmem>>, vector<128x128xf32>
      %cst_25 = arith.constant dense<0.000000e+00> : vector<16x128xf32>
      %39 = tpu.matmul %31, %38, %cst_25 {dimension_numbers = #tpu.dot_dimension_numbers<[1], [0], [0], [1], [0, 0, 1, 1], [], []>} : vector<16x128xf32>, vector<128x128xf32>, vector<16x128xf32> -> vector<16x128xf32>
      %c0_26 = arith.constant 0 : index
      %c0_27 = arith.constant 0 : index
      %40 = vector.load %arg8[%c0_26, %c0_27] : memref<16x1xf32, #tpu.memory_space<vmem>>, vector<16x1xf32>
      %cst_28 = arith.constant 1.000000e+00 : f32
      %41 = vector.broadcast %cst_28 : f32 to vector<16x1xf32>
      %42 = arith.subf %40, %41 : vector<16x1xf32>
      %cst_29 = arith.constant 1.000000e+30 : f32
      %43 = vector.broadcast %cst_29 : f32 to vector<16x1xf32>
      %44 = arith.mulf %42, %43 : vector<16x1xf32>
      %45 = vector.broadcast %44 : vector<16x1xf32> to vector<16x128xf32>
      %46 = arith.addf %39, %45 : vector<16x128xf32>
      %c0_30 = arith.constant 0 : index
      %c0_31 = arith.constant 0 : index
      %47 = vector.load %arg17[%c0_30, %c0_31] : memref<1x128xf32, #tpu.memory_space<vmem>>, vector<1x128xf32>
      %cst_32 = arith.constant dense<0xFF800000> : vector<128xf32>
      %48 = vector.multi_reduction <maximumf>, %46, %cst_32 [0] : vector<16x128xf32> to vector<128xf32>
      %49 = vector.shape_cast %48 : vector<128xf32> to vector<1x128xf32>
      %50 = arith.maximumf %47, %49 : vector<1x128xf32>
      %51 = arith.cmpf ogt, %49, %47 : vector<1x128xf32>
      %cst_33 = arith.constant 1.000000e+00 : f32
      %cst_34 = arith.constant 0.000000e+00 : f32
      %52 = vector.broadcast %cst_33 : f32 to vector<1x128xf32>
      %53 = vector.broadcast %cst_34 : f32 to vector<1x128xf32>
      %54 = arith.select %51, %52, %53 : vector<1x128xi1>, vector<1x128xf32>
      %55 = vector.shape_cast %54 : vector<1x128xf32> to vector<1x1x128xf32>
      %cst_35 = arith.constant dense<0xFF800000> : vector<1xf32>
      %56 = vector.multi_reduction <maximumf>, %55, %cst_35 [1, 2] : vector<1x1x128xf32> to vector<1xf32>
      %57 = vector.shape_cast %56 : vector<1xf32> to vector<1x1x1xf32>
      %58 = vector.extract %57[0, 0, 0] : f32 from vector<1x1x1xf32>
      %cst_36 = arith.constant 0.000000e+00 : f32
      %59 = arith.cmpf ogt, %58, %cst_36 : f32
      %c0_37 = arith.constant 0 : index
      %c0_38 = arith.constant 0 : index
      %60 = vector.load %arg15[%c0_37, %c0_38] : memref<128x128xf32, #tpu.memory_space<vmem>>, vector<128x128xf32>
      %61 = arith.extui %59 : i1 to i32
      %c0_i32_39 = arith.constant 0 : i32
      %62 = arith.cmpi ne, %61, %c0_i32_39 : i32
      scf.if %62 {
        %84 = arith.subf %47, %50 : vector<1x128xf32>
        %85 = math.exp %84 : vector<1x128xf32>
        %86 = vector.shape_cast %85 : vector<1x128xf32> to vector<1x128xf32>
        %87 = vector.broadcast %86 : vector<1x128xf32> to vector<8x128xf32>
        %cst_50 = arith.constant dense<0.000000e+00> : vector<8x128xf32>
        %88 = tpu.matmul %87, %60, %cst_50 {dimension_numbers = #tpu.dot_dimension_numbers<[1], [0], [0], [1], [0, 0, 1, 1], [], []>} : vector<8x128xf32>, vector<128x128xf32>, vector<8x128xf32> -> vector<8x128xf32>
        %89 = vector.extract_strided_slice %88 {offsets = [0, 0], sizes = [1, 128], strides = [1, 1]} : vector<8x128xf32> to vector<1x128xf32>
        %c0_51 = arith.constant 0 : index
        %c0_52 = arith.constant 0 : index
        %90 = vector.load %arg18[%c0_51, %c0_52] : memref<8x256xf32, #tpu.memory_space<vmem>>, vector<8x256xf32>
        %91 = tpu.concatenate %89, %85 in 1 : vector<1x128xf32>, vector<1x128xf32> -> vector<1x256xf32>
        %92 = vector.broadcast %91 : vector<1x256xf32> to vector<8x256xf32>
        %93 = arith.mulf %90, %92 : vector<8x256xf32>
        %c0_53 = arith.constant 0 : index
        %c0_54 = arith.constant 0 : index
        %94 = vector.load %arg18[%c0_53, %c0_54] : memref<8x256xf32, #tpu.memory_space<vmem>>, vector<8x256xf32>
        tpu.vector_store %arg18[%c0_53, %c0_54], %93 {strides = array<i32>} : memref<8x256xf32, #tpu.memory_space<vmem>>, vector<8x256xf32>,
      } else {
      }
      %c0_40 = arith.constant 0 : index
      %c0_41 = arith.constant 0 : index
      %63 = vector.load %arg17[%c0_40, %c0_41] : memref<1x128xf32, #tpu.memory_space<vmem>>, vector<1x128xf32>
      tpu.vector_store %arg17[%c0_40, %c0_41], %50 {strides = array<i32>} : memref<1x128xf32, #tpu.memory_space<vmem>>, vector<1x128xf32>,
      %64 = vector.broadcast %50 : vector<1x128xf32> to vector<16x128xf32>
      %65 = arith.subf %46, %64 : vector<16x128xf32>
      %66 = math.exp %65 : vector<16x128xf32>
      %cst_42 = arith.constant dense<0.000000e+00> : vector<16x128xf32>
      %67 = tpu.matmul %66, %60, %cst_42 {dimension_numbers = #tpu.dot_dimension_numbers<[1], [0], [0], [1], [0, 0, 1, 1], [], []>} : vector<16x128xf32>, vector<128x128xf32>, vector<16x128xf32> -> vector<16x128xf32>
      %c0_43 = arith.constant 0 : index
      %c0_44 = arith.constant 0 : index
      %68 = vector.load %arg7[%c0_43, %c0_44] : memref<1x16xi32, #tpu.memory_space<vmem>>, vector<1x16xi32>
      %69 = tpu.iota {dimensions = array<i32: 0>} : vector<8x1xi32>
      %c8_i32 = arith.constant 8 : i32
      %70 = arith.muli %arg0, %c8_i32 : i32
      %71 = vector.broadcast %70 : i32 to vector<8x1xi32>
      %72 = arith.addi %69, %71 : vector<8x1xi32>
      %73 = vector.broadcast %72 : vector<8x1xi32> to vector<8x16xi32>
      %74 = vector.broadcast %68 : vector<1x16xi32> to vector<8x16xi32>
      %75 = arith.cmpi eq, %73, %74 : vector<8x16xi32>
      %76 = arith.extui %75 : vector<8x16xi1> to vector<8x16xi32>
      %77 = arith.sitofp %76 : vector<8x16xi32> to vector<8x16xf32>
      %78 = arith.mulf %67, %37 : vector<16x128xf32>
      %79 = tpu.concatenate %78, %66 in 1 : vector<16x128xf32>, vector<16x128xf32> -> vector<16x256xf32>
      %c0_45 = arith.constant 0 : index
      %c0_46 = arith.constant 0 : index
      %80 = vector.load %arg18[%c0_45, %c0_46] : memref<8x256xf32, #tpu.memory_space<vmem>>, vector<8x256xf32>
      %cst_47 = arith.constant dense<0.000000e+00> : vector<8x256xf32>
      %81 = tpu.matmul %77, %79, %cst_47 {dimension_numbers = #tpu.dot_dimension_numbers<[1], [0], [0], [1], [0, 0, 1, 1], [], []>} : vector<8x16xf32>, vector<16x256xf32>, vector<8x256xf32> -> vector<8x256xf32>
      %82 = arith.addf %80, %81 : vector<8x256xf32>
      %c0_48 = arith.constant 0 : index
      %c0_49 = arith.constant 0 : index
      %83 = vector.load %arg18[%c0_48, %c0_49] : memref<8x256xf32, #tpu.memory_space<vmem>>, vector<8x256xf32>
      tpu.vector_store %arg18[%c0_48, %c0_49], %82 {strides = array<i32>} : memref<8x256xf32, #tpu.memory_space<vmem>>, vector<8x256xf32>,
    } else {
    }
    %c0_i32_2 = arith.constant 0 : i32
    %8 = arith.cmpi eq, %arg1, %c0_i32_2 : i32
    %9 = arith.extui %8 : i1 to i32
    %c0_i32_3 = arith.constant 0 : i32
    %10 = arith.cmpi ne, %9, %c0_i32_3 : i32
    scf.if %10 {
      %c0 = arith.constant 0 : index
      %c0_4 = arith.constant 0 : index
      %11 = vector.load %arg18[%c0, %c0_4] : memref<8x256xf32, #tpu.memory_space<vmem>>, vector<8x256xf32>
      %12 = vector.extract_strided_slice %11 {offsets = [0, 128], sizes = [8, 128], strides = [1, 1]} : vector<8x256xf32> to vector<8x128xf32>
      %c0_5 = arith.constant 0 : index
      %c0_6 = arith.constant 0 : index
      %13 = vector.load %arg15[%c0_5, %c0_6] : memref<128x128xf32, #tpu.memory_space<vmem>>, vector<128x128xf32>
      %cst = arith.constant dense<0.000000e+00> : vector<8x128xf32>
      %14 = tpu.matmul %12, %13, %cst {dimension_numbers = #tpu.dot_dimension_numbers<[1], [0], [0], [1], [0, 0, 1, 1], [], []>} : vector<8x128xf32>, vector<128x128xf32>, vector<8x128xf32> -> vector<8x128xf32>
      %15 = vector.extract_strided_slice %11 {offsets = [0, 0], sizes = [8, 128], strides = [1, 1]} : vector<8x256xf32> to vector<8x128xf32>
      %cst_7 = arith.constant 1.000000e-16 : f32
      %16 = vector.broadcast %cst_7 : f32 to vector<8x128xf32>
      %17 = arith.addf %14, %16 : vector<8x128xf32>
      %18 = arith.divf %15, %17 : vector<8x128xf32>
      %c0_8 = arith.constant 0 : index
      %c0_9 = arith.constant 0 : index
      %19 = vector.load %arg16[%c0_8, %c0_9] : memref<8x128xf32, #tpu.memory_space<vmem>>, vector<8x128xf32>
      tpu.vector_store %arg16[%c0_8, %c0_9], %18 {strides = array<i32>} : memref<8x128xf32, #tpu.memory_space<vmem>>, vector<8x128xf32>,
    } else {
    }
    return
  }
  func.func @transform_0(%arg0: i32, %arg1: i32, %arg2: memref<1xi32, #tpu.memory_space<smem>>, %arg3: memref<1xi32, #tpu.memory_space<smem>>) -> (i32, i32) {
    %0 = arith.index_cast %arg0 : i32 to index
    %1 = memref.load %arg2[%0] : memref<1xi32, #tpu.memory_space<smem>>
    %2 = arith.index_cast %arg0 : i32 to index
    %3 = memref.load %arg3[%2] : memref<1xi32, #tpu.memory_space<smem>>
    %c1_i32 = arith.constant 1 : i32
    %4 = arith.subi %3, %c1_i32 : i32
    %c0_i32 = arith.constant 0 : i32
    %5 = arith.maxsi %4, %c0_i32 : i32
    %6 = arith.minsi %arg1, %5 : i32
    %7 = arith.addi %1, %6 : i32
    %c0_i32_0 = arith.constant 0 : i32
    %c0_i32_1 = arith.constant 0 : i32
    return %7, %c0_i32_0 : i32, i32
  }
  func.func @transform_1(%arg0: i32, %arg1: i32, %arg2: memref<1xi32, #tpu.memory_space<smem>>, %arg3: memref<1xi32, #tpu.memory_space<smem>>) -> (i32, i32) {
    %0 = arith.index_cast %arg0 : i32 to index
    %1 = memref.load %arg2[%0] : memref<1xi32, #tpu.memory_space<smem>>
    %2 = arith.index_cast %arg0 : i32 to index
    %3 = memref.load %arg3[%2] : memref<1xi32, #tpu.memory_space<smem>>
    %c1_i32 = arith.constant 1 : i32
    %4 = arith.subi %3, %c1_i32 : i32
    %c0_i32 = arith.constant 0 : i32
    %5 = arith.maxsi %4, %c0_i32 : i32
    %6 = arith.minsi %arg1, %5 : i32
    %7 = arith.addi %1, %6 : i32
    %c0_i32_0 = arith.constant 0 : i32
    %c0_i32_1 = arith.constant 0 : i32
    return %7, %c0_i32_0 : i32, i32
  }
  func.func @transform_2(%arg0: i32, %arg1: i32, %arg2: memref<1xi32, #tpu.memory_space<smem>>, %arg3: memref<1xi32, #tpu.memory_space<smem>>) -> (i32, i32) {
    %0 = arith.index_cast %arg0 : i32 to index
    %1 = memref.load %arg2[%0] : memref<1xi32, #tpu.memory_space<smem>>
    %2 = arith.index_cast %arg0 : i32 to index
    %3 = memref.load %arg3[%2] : memref<1xi32, #tpu.memory_space<smem>>
    %c1_i32 = arith.constant 1 : i32
    %4 = arith.subi %3, %c1_i32 : i32
    %c0_i32 = arith.constant 0 : i32
    %5 = arith.maxsi %4, %c0_i32 : i32
    %6 = arith.minsi %arg1, %5 : i32
    %7 = arith.addi %1, %6 : i32
    %c0_i32_0 = arith.constant 0 : i32
    %c0_i32_1 = arith.constant 0 : i32
    return %7, %c0_i32_0 : i32, i32
  }
  func.func @transform_3(%arg0: i32, %arg1: i32, %arg2: memref<1xi32, #tpu.memory_space<smem>>, %arg3: memref<1xi32, #tpu.memory_space<smem>>) -> (i32, i32) {
    %0 = arith.index_cast %arg0 : i32 to index
    %1 = memref.load %arg2[%0] : memref<1xi32, #tpu.memory_space<smem>>
    %2 = arith.index_cast %arg0 : i32 to index
    %3 = memref.load %arg3[%2] : memref<1xi32, #tpu.memory_space<smem>>
    %c1_i32 = arith.constant 1 : i32
    %4 = arith.subi %3, %c1_i32 : i32
    %c0_i32 = arith.constant 0 : i32
    %5 = arith.maxsi %4, %c0_i32 : i32
    %6 = arith.minsi %arg1, %5 : i32
    %7 = arith.addi %1, %6 : i32
    %c0_i32_0 = arith.constant 0 : i32
    %c0_i32_1 = arith.constant 0 : i32
    return %c0_i32_0, %7 : i32, i32
  }
  func.func @transform_4(%arg0: i32, %arg1: i32, %arg2: memref<1xi32, #tpu.memory_space<smem>>, %arg3: memref<1xi32, #tpu.memory_space<smem>>) -> (i32, i32) {
    %0 = arith.index_cast %arg0 : i32 to index
    %1 = memref.load %arg2[%0] : memref<1xi32, #tpu.memory_space<smem>>
    %2 = arith.index_cast %arg0 : i32 to index
    %3 = memref.load %arg3[%2] : memref<1xi32, #tpu.memory_space<smem>>
    %c1_i32 = arith.constant 1 : i32
    %4 = arith.subi %3, %c1_i32 : i32
    %c0_i32 = arith.constant 0 : i32
    %5 = arith.maxsi %4, %c0_i32 : i32
    %6 = arith.minsi %arg1, %5 : i32
    %7 = arith.addi %1, %6 : i32
    %c0_i32_0 = arith.constant 0 : i32
    %c0_i32_1 = arith.constant 0 : i32
    return %7, %c0_i32_0 : i32, i32
  }
  func.func @transform_5(%arg0: i32, %arg1: i32, %arg2: memref<1xi32, #tpu.memory_space<smem>>, %arg3: memref<1xi32, #tpu.memory_space<smem>>) -> (i32, i32) {
    %c0_i32 = arith.constant 0 : i32
    %c0_i32_0 = arith.constant 0 : i32
    %c0_i32_1 = arith.constant 0 : i32
    return %c0_i32, %c0_i32_0 : i32, i32
  }
  func.func @transform_6(%arg0: i32, %arg1: i32, %arg2: memref<1xi32, #tpu.memory_space<smem>>, %arg3: memref<1xi32, #tpu.memory_space<smem>>) -> (i32, i32) {
    %c0_i32 = arith.constant 0 : i32
    %c0_i32_0 = arith.constant 0 : i32
    %c0_i32_1 = arith.constant 0 : i32
    return %c0_i32, %c0_i32_0 : i32, i32
  }
  func.func @transform_7(%arg0: i32, %arg1: i32, %arg2: memref<1xi32, #tpu.memory_space<smem>>, %arg3: memref<1xi32, #tpu.memory_space<smem>>) -> (i32, i32) {
    %c0_i32 = arith.constant 0 : i32
    %c0_i32_0 = arith.constant 0 : i32
    %c0_i32_1 = arith.constant 0 : i32
    return %c0_i32, %c0_i32_0 : i32, i32
  }
  func.func @transform_8(%arg0: i32, %arg1: i32, %arg2: memref<1xi32, #tpu.memory_space<smem>>, %arg3: memref<1xi32, #tpu.memory_space<smem>>) -> (i32, i32) {
    %c0_i32 = arith.constant 0 : i32
    %c0_i32_0 = arith.constant 0 : i32
    %c0_i32_1 = arith.constant 0 : i32
    return %c0_i32, %c0_i32_0 : i32, i32
  }
  func.func @transform_9(%arg0: i32, %arg1: i32, %arg2: memref<1xi32, #tpu.memory_space<smem>>, %arg3: memref<1xi32, #tpu.memory_space<smem>>) -> (i32, i32) {
    %c0_i32 = arith.constant 0 : i32
    %c0_i32_0 = arith.constant 0 : i32
    %c0_i32_1 = arith.constant 0 : i32
    return %c0_i32, %c0_i32_0 : i32, i32
  }
  func.func @transform_10(%arg0: i32, %arg1: i32, %arg2: memref<1xi32, #tpu.memory_space<smem>>, %arg3: memref<1xi32, #tpu.memory_space<smem>>) -> (i32, i32) {
    %c0_i32 = arith.constant 0 : i32
    %c0_i32_0 = arith.constant 0 : i32
    %c0_i32_1 = arith.constant 0 : i32
    return %c0_i32, %c0_i32_0 : i32, i32
  }
  func.func @transform_11(%arg0: i32, %arg1: i32, %arg2: memref<1xi32, #tpu.memory_space<smem>>, %arg3: memref<1xi32, #tpu.memory_space<smem>>) -> (i32, i32) {
    %c0_i32 = arith.constant 0 : i32
    %c0_i32_0 = arith.constant 0 : i32
    %c0_i32_1 = arith.constant 0 : i32
    return %c0_i32, %c0_i32_0 : i32, i32
  }
  func.func @transform_12(%arg0: i32, %arg1: i32, %arg2: memref<1xi32, #tpu.memory_space<smem>>, %arg3: memref<1xi32, #tpu.memory_space<smem>>) -> (i32, i32) {
    %c0_i32 = arith.constant 0 : i32
    %c0_i32_0 = arith.constant 0 : i32
    return %arg0, %c0_i32 : i32, i32
  }
}

</mosaic_0001>

<bundles_post_ra>
// kernel: tpu_custom_call.1
= control target key start
LH: loop header
LB: loop body
LE: loop exit
PB: predicated region body
PF: predicated region fallthrough
CT: control target
= control target key end

     0   :  { %s1521_s0 = inlined_call_operand.<no memory space> [shape: s32[1], index: 0, kind: input, shape index: {}]   ;;  %s1522_s1 = inlined_call_operand.<no memory space> [shape: s32[1], index: 1, kind: input, shape index: {}]   ;;  %s1523_s2 = inlined_call_operand.vmem [shape: f32[16,128], index: 2, kind: input, shape index: {}]   ;;  %s1524_s3 = inlined_call_operand.hbm [shape: f32[16,128], index: 3, kind: input, shape index: {}]   ;;  %s1525_s4 = inlined_call_operand.hbm [shape: f32[16,128], index: 4, kind: input, shape index: {}]   ;;  %s1526_s5 = inlined_call_operand.vmem [shape: s32[1,16], index: 5, kind: input, shape index: {}]   ;;  %s1527_s6 = inlined_call_operand.vmem [shape: f32[16,1], index: 6, kind: input, shape index: {}]   ;;  %s1528_s7 = inlined_call_operand.hbm [shape: f32[128,128], index: 7, kind: input, shape index: {}]   ;;  %s1529_s8 = inlined_call_operand.hbm [shape: f32[128,256], index: 8, kind: input, shape index: {}]   ;;  %s1530_s9 = inlined_call_operand.hbm [shape: f32[128,256], index: 9, kind: input, shape index: {}]   ;;  %s1531_s10 = inlined_call_operand.vmem [shape: f32[1,128], index: 10, kind: input, shape index: {}]   ;;  %s1532_s11 = inlined_call_operand.vmem [shape: f32[1,128], index: 11, kind: input, shape index: {}]   ;;  %s1533_s12 = inlined_call_operand.hbm [shape: f32[128,128], index: 12, kind: input, shape index: {}]   ;;  %s1534_s13 = inlined_call_operand.hbm [shape: f32[128,128], index: 13, kind: input, shape index: {}]   ;;  %s1535_s14 = inlined_call_operand.hbm [shape: f32[8,128], index: 14, kind: output, shape index: {}]  }
   0x1   :  { %1536 = sst [smem:[#allocation25_spill]] %s1535_s14 }
   0x2   :  { %21 = vsyncpa [#allocation8], 0 }
   0x3   :  { %22 = vsyncpa [#allocation11], 0 }
   0x4   :  { %23 = vsyncpa [#allocation14], 0 }
   0x5   :  { %24 = vsyncpa [#allocation17], 0  ;;  %s917_s15 = sadd.s32 4294967295, %s1522_s1 }
   0x6   :  { %25 = vsyncpa [#allocation9], 0  ;;  %p55_p0 = scmp.gt.s32.totalorder %s917_s15, 0  ;;  %s160_s18 = sshll.u32 %s1529_s8, 4  ;;  %s1338_s18 = int_to_ptr.hbm [resolvable:$true] %s160_s18 }
   0x7   :  { %s1239_s19 = smov [#allocation10]   ;;  %s1240_s24 = smov [#allocation13]  }
   0x8   :  { %s1539_s15 = smov (!%p55_p0, %s917_s15), 0  ;;  %s1336_s20 = sshll.u32 %s1239_s19, 4  ;;  %s92_s20 = int_to_ptr.vmem [resolvable:$true] %s1336_s20 }
   0x9   :  { %s1541_s15 = smov (%p55_p0, %s1539_s15), 0  ;;  %s162_s25 = sshll.u32 %s1240_s24, 4  ;;  %s163_s25 = int_to_ptr.vmem [resolvable:$true] %s162_s25 }
   0xa   :  { %s1344_s23 = sadd.s32 %s1541_s15, %s1521_s0  ;;  %s190_s17 = sshll.u32 %s1533_s12, 4  ;;  %s191_s17 = int_to_ptr.hbm [resolvable:$true] %s190_s17 }
   0xb   :  { %s945_s26 = sshll.u32 %s1344_s23, 4  ;;  %s1041_s22 = scalar_lea.hbm %s1525_s4, 16 }
   0xc   :  { %s88_s28 = scalar_lea.hbm %s1525_s4, %s945_s26 }
   0xd   :  { %s89_s29 = sshll.u32 %s88_s28, 4  ;;  %s90_s29 = int_to_ptr.hbm [resolvable:$true] %s89_s29 }
   0xe   :  { %s1037_s19 = sshra.s32 %s90_s29, 4  ;;  %s1038_s19 = int_to_ptr.hbm [resolvable:$true] %s1037_s19 }
   0xf   :  { %s1039_s21 = scalar_lea.hbm %s1038_s19, 16  ;;  %p1042_p2 = scmp.lt.s32.totalorder %s1038_s19, %s1525_s4 }
  0x10   :  { %p1040_p1 = scmp.ne.s32.totalorder %s1038_s19, %s1039_s21  ;;  %p1043_p3 = scmp.lt.s32.totalorder %s1041_s22, %s1039_s21 }
  0x12   :  { %p1044_p4 = por %p1043_p3, %p1042_p2 }
  0x14   :  { %p1045_p5 = pnand %p1044_p4, %p1040_p1 }
  0x16   :  { %1048 = shalt.err (!%p1045_p5)
}
  0x17   :  { %s1241_s8 = smov 128   ;;  %s1242_s27 = smov 8  }
  0x18   :  { %97 = dma.hbm_to_vmem [thread:$0]  %s90_s29, 256, %s92_s20, [#allocation11], %s1241_s8, %s1241_s8, %s1242_s27  }
  0x19   :  { %s1243_s12 = smov 256   ;;  %s1244_s28 = smov 16  }
  0x1a   :  { %168 = dma.hbm_to_vmem [thread:$0]  %s1338_s18, 4096, %s163_s25, [#allocation14], %s1243_s12, %s1243_s12, %s1244_s28  }
  0x1b   :  { %s1245_s14 = smov [#allocation16]   ;;  %s64_s19 = scalar_lea.hbm %s1524_s3, %s945_s26 }
  0x1c   :  { %s192_s4 = sshll.u32 %s1245_s14, 4  ;;  %s65_s21 = sshll.u32 %s64_s19, 4  ;;  %s193_s4 = int_to_ptr.vmem [resolvable:$true] %s192_s4  ;;  %s66_s21 = int_to_ptr.hbm [resolvable:$true] %s65_s21 }
  0x1d   :  { %198 = dma.hbm_to_vmem [thread:$0]  %s191_s17, 2048, %s193_s4, [#allocation17], %s1241_s8, %s1241_s8, %s1242_s27  }
  0x1e   :  { %s1246_s20 = smov [#allocation7]   ;;  %s147_s18 = sshll.u32 %s1528_s7, 4  ;;  %s148_s18 = int_to_ptr.hbm [resolvable:$true] %s147_s18 }
  0x1f   :  { %s67_s29 = sshll.u32 %s1246_s20, 4  ;;  %s1109_s25 = sshra.s32 %s66_s21, 4  ;;  %s68_s29 = int_to_ptr.vmem [resolvable:$true] %s67_s29  ;;  %s1110_s25 = int_to_ptr.hbm [resolvable:$true] %s1109_s25 }
  0x20   :  { %s1111_s22 = scalar_lea.hbm %s1110_s25, 16  ;;  %s1113_s14 = scalar_lea.hbm %s1524_s3, 16 }
  0x21   :  { %p1112_p6 = scmp.ne.s32.totalorder %s1110_s25, %s1111_s22  ;;  %p1114_p7 = scmp.lt.s32.totalorder %s1110_s25, %s1524_s3 }
  0x22   :  { %p1115_p8 = scmp.lt.s32.totalorder %s1113_s14, %s1111_s22 }
  0x24   :  { %p1116_p9 = por %p1115_p8, %p1114_p7 }
  0x26   :  { %p1117_p10 = pnand %p1116_p9, %p1112_p6 }
  0x28   :  { %1120 = shalt.err (!%p1117_p10)
}
  0x29   :  { %73 = dma.hbm_to_vmem [thread:$0]  %s66_s21, 256, %s68_s29, [#allocation8], %s1241_s8, %s1241_s8, %s1242_s27  }
  0x2a   :  { %s173_s4 = sshll.u32 %s1530_s9, 4  ;;  %s1247_s19 = smov [#allocation12]   ;;  %s174_s4 = int_to_ptr.hbm [resolvable:$true] %s173_s4 }
  0x2b   :  { %s149_s20 = sshll.u32 %s1247_s19, 4  ;;  %s1248_s3 = smov [#allocation15]   ;;  %s150_s20 = int_to_ptr.vmem [resolvable:$true] %s149_s20 }
  0x2c   :  { %155 = dma.hbm_to_vmem [thread:$0]  %s148_s18, 2048, %s150_s20, [#allocation11], %s1241_s8, %s1241_s8, %s1242_s27  }
  0x2d   :  { %s175_s0 = sshll.u32 %s1248_s3, 4  ;;  %s203_s22 = sshll.u32 %s1534_s13, 4  ;;  %s176_s0 = int_to_ptr.vmem [resolvable:$true] %s175_s0  ;;  %s204_s22 = int_to_ptr.hbm [resolvable:$true] %s203_s22 }
  0x2e   :  { %181 = dma.hbm_to_vmem [thread:$0]  %s174_s4, 4096, %s176_s0, [#allocation14], %s1243_s12, %s1243_s12, %s1244_s28  }
  0x2f   :  { %s1249_s9 = smov [#allocation18]  }
  0x30   :  { %s205_s21 = sshll.u32 %s1249_s9, 4  ;;  %s206_s21 = int_to_ptr.vmem [resolvable:$true] %s205_s21 }
  0x31   :  { %211 = dma.hbm_to_vmem [thread:$0]  %s204_s22, 2048, %s206_s21, [#allocation17], %s1241_s8, %s1241_s8, %s1242_s27  }
  0x32   :  { %1229 = dma.done.wait [#allocation8], 256  }
  0x33   :  { %1230 = vsyncadd [#allocation8], 4294967040 }
  0x34   :  { %1231 = dma.done.wait [#allocation11], 2304  }
  0x35   :  { %1232 = vsyncadd [#allocation11], 4294964992 }
  0x36   :  { %1233 = dma.done.wait [#allocation14], 8192  }
  0x37   :  { %1234 = vsyncadd [#allocation14], 4294959104 }
  0x38   :  { %1235 = dma.done.wait [#allocation17], 4096  }
  0x39   :  { %1236 = vsyncadd [#allocation17], 4294963200  ;;  %s927_s13 = sshll.u32 %s1344_s23, 1  ;;  %p325_p11 = scmp.lt.s32.totalorder %s1344_s23, 0  ;;  %v1250_v0 = vmov -1e+30  }
  0x3a   :  { %p286_p12 = scmp.lt.s32.totalorder %s927_s13, 1  ;;  %362 = vst [vmem:[#allocation2] sm:$0x1] %v1250_v0  ;;  %v1251_v1 = vmov 0.0   ;;  %p936_p13 = scmp.le.s32.totalorder %s1522_s1, 0 }
  0x3b   :  { %s1543_s23 = smov (!%p325_p11, %s1344_s23), 0  ;;  %363 = vst [vmem:[#allocation3] sm:$0xff] %v1251_v1 }
  0x3c   :  { %s1545_s13 = smov (!%p286_p12, %s927_s13), 1  ;;  %364 = vst [vmem:[#allocation3 + $0x8] sm:$0xff] %v1251_v1  ;;  %s327_s12 = scalar_lea.vmem %s1526_s5, %s1543_s23 }
  0x3d   :  { %s928_s28 = sshll.u32 %s1545_s13, 3  ;;  %369 = sbr.rel (%p936_p13) target bundleno = 1061 (0x425), region = 85 }
  0x3e   :  { %s1411_s26 = scalar_lea.vmem %s1523_s2, %s928_s28  ;;  %s1416_s30 = scalar_lea.vmem %s1527_s6, %s928_s28 }
  0x42   :  { %v422_v2 = vld [vmem:[#allocation13 + $0xf0] sm:$0xff]  ;;  %v420_v4 = vld [vmem:[#allocation13 + $0xe0] sm:$0xff]  ;;  %v391_v34 = vld [vmem:[#allocation12 + $0x78] sm:$0xff]  ;;  %vm659_vm2 = vcmask 1040384  }
  0x43   :  { %v500_v3 = vld [vmem:[#allocation15 + $0xf0] sm:$0xff]  ;;  %424 = vmatpush.msra.mxu0 %v422_v2  ;;  %v498_v5 = vld [vmem:[#allocation15 + $0xe0] sm:$0xff]  ;;  %v423_v38 = vld [vmem:[#allocation13 + $0xf8] sm:$0xff] }
  0x44   :  { %502 = vmatpush.msra.mxu2 %v500_v3  ;;  %v418_v6 = vld [vmem:[#allocation13 + $0xd0] sm:$0xff]  ;;  %v416_v8 = vld [vmem:[#allocation13 + $0xc0] sm:$0xff]  ;;  %v501_v39 = vld [vmem:[#allocation15 + $0xf8] sm:$0xff]  ;;  %447 = vmatpush.msra.mxu1 %v423_v38 }
  0x45   :  { %v496_v7 = vld [vmem:[#allocation15 + $0xd0] sm:$0xff]  ;;  %425 = vmatpush.msra.mxu0 %v420_v4  ;;  %v494_v9 = vld [vmem:[#allocation15 + $0xc0] sm:$0xff]  ;;  %v389_v40 = vld [vmem:[#allocation12 + $0x68] sm:$0xff]  ;;  %525 = vmatpush.msra.mxu3 %v501_v39 }
  0x46   :  { %503 = vmatpush.msra.mxu2 %v498_v5  ;;  %v414_v10 = vld [vmem:[#allocation13 + $0xb0] sm:$0xff]  ;;  %v412_v12 = vld [vmem:[#allocation13 + $0xa0] sm:$0xff]  ;;  %v421_v41 = vld [vmem:[#allocation13 + $0xe8] sm:$0xff] }
  0x47   :  { %426 = vmatpush.msra.mxu0 %v418_v6  ;;  %v492_v11 = vld [vmem:[#allocation15 + $0xb0] sm:$0xff]  ;;  %v490_v13 = vld [vmem:[#allocation15 + $0xa0] sm:$0xff]  ;;  %v499_v42 = vld [vmem:[#allocation15 + $0xe8] sm:$0xff]  ;;  %448 = vmatpush.msra.mxu1 %v421_v41  ;;  %v1252_v41 = vmov 0  }
  0x48   :  { %504 = vmatpush.msra.mxu2 %v496_v7  ;;  %v410_v14 = vld [vmem:[#allocation13 + $0x90] sm:$0xff]  ;;  %v408_v16 = vld [vmem:[#allocation13 + $0x80] sm:$0xff]  ;;  %v419_v44 = vld [vmem:[#allocation13 + $0xd8] sm:$0xff]  ;;  %526 = vmatpush.msra.mxu3 %v499_v42 }
  0x49   :  { %427 = vmatpush.msra.mxu0 %v416_v8  ;;  %v488_v15 = vld [vmem:[#allocation15 + $0x90] sm:$0xff]  ;;  %v486_v17 = vld [vmem:[#allocation15 + $0x80] sm:$0xff]  ;;  %v497_v45 = vld [vmem:[#allocation15 + $0xd8] sm:$0xff]  ;;  %449 = vmatpush.msra.mxu1 %v419_v44 }
  0x4a   :  { %505 = vmatpush.msra.mxu2 %v494_v9  ;;  %v406_v18 = vld [vmem:[#allocation13 + $0x70] sm:$0xff]  ;;  %v404_v20 = vld [vmem:[#allocation13 + $0x60] sm:$0xff]  ;;  %v387_v46 = vld [vmem:[#allocation12 + $0x58] sm:$0xff]  ;;  %527 = vmatpush.msra.mxu3 %v497_v45 }
  0x4b   :  { %428 = vmatpush.msra.mxu0 %v414_v10  ;;  %v484_v19 = vld [vmem:[#allocation15 + $0x70] sm:$0xff]  ;;  %v482_v21 = vld [vmem:[#allocation15 + $0x60] sm:$0xff]  ;;  %v1427_v47 = vld [vmem:[#allocation7 + $0x8] sm:$0xff]  ;;  %1025 = vset.pattern.permute.xlu0 %v1252_v41 }
  0x4c   :  { %506 = vmatpush.msra.mxu2 %v492_v11  ;;  %v402_v22 = vld [vmem:[#allocation13 + $0x50] sm:$0xff]  ;;  %v400_v24 = vld [vmem:[#allocation13 + $0x40] sm:$0xff]  ;;  %v1429_v48 = vld [vmem:[#allocation10 + $0x8] sm:$0xff] }
  0x4d   :  { %429 = vmatpush.msra.mxu0 %v412_v12  ;;  %v480_v23 = vld [vmem:[#allocation15 + $0x50] sm:$0xff]  ;;  %v478_v25 = vld [vmem:[#allocation15 + $0x40] sm:$0xff]  ;;  %v417_v50 = vld [vmem:[#allocation13 + $0xc8] sm:$0xff] }
  0x4e   :  { %507 = vmatpush.msra.mxu2 %v490_v13  ;;  %v398_v26 = vld [vmem:[#allocation13 + $0x30] sm:$0xff]  ;;  %v396_v28 = vld [vmem:[#allocation13 + $0x20] sm:$0xff]  ;;  %v495_v51 = vld [vmem:[#allocation15 + $0xc8] sm:$0xff]  ;;  %450 = vmatpush.msra.mxu1 %v417_v50 }
  0x4f   :  { %430 = vmatpush.msra.mxu0 %v410_v14  ;;  %v476_v27 = vld [vmem:[#allocation15 + $0x30] sm:$0xff]  ;;  %v474_v29 = vld [vmem:[#allocation15 + $0x20] sm:$0xff]  ;;  %v385_v52 = vld [vmem:[#allocation12 + $0x48] sm:$0xff]  ;;  %528 = vmatpush.msra.mxu3 %v495_v51 }
  0x50   :  { %508 = vmatpush.msra.mxu2 %v488_v15  ;;  %v394_v30 = vld [vmem:[#allocation13 + $0x10] sm:$0xff]  ;;  %v392_v32 = vld [vmem:[#allocation13] sm:$0xff]  ;;  %v415_v53 = vld [vmem:[#allocation13 + $0xb8] sm:$0xff] }
  0x51   :  { %431 = vmatpush.msra.mxu0 %v408_v16  ;;  %v472_v31 = vld [vmem:[#allocation15 + $0x10] sm:$0xff]  ;;  %v470_v33 = vld [vmem:[#allocation15] sm:$0xff]  ;;  %v493_v54 = vld [vmem:[#allocation15 + $0xb8] sm:$0xff]  ;;  %451 = vmatpush.msra.mxu1 %v415_v53 }
  0x52   :  { %509 = vmatpush.msra.mxu2 %v486_v17  ;;  %v1421_v35 = vld [vmem:[#allocation7] sm:$0xff]  ;;  %v1423_v36 = vld [vmem:[#allocation10] sm:$0xff]  ;;  %v413_v56 = vld [vmem:[#allocation13 + $0xa8] sm:$0xff]  ;;  %529 = vmatpush.msra.mxu3 %v493_v54 }
  0x53   :  { %432 = vmatpush.msra.mxu0 %v406_v18  ;;  %v390_v37 = vld [vmem:[#allocation12 + $0x70] sm:$0xff]  ;;  %v388_v43 = vld [vmem:[#allocation12 + $0x60] sm:$0xff]  ;;  %v491_v57 = vld [vmem:[#allocation15 + $0xa8] sm:$0xff]  ;;  %452 = vmatpush.msra.mxu1 %v413_v56 }
  0x54   :  { %510 = vmatpush.msra.mxu2 %v484_v19  ;;  %v386_v49 = vld [vmem:[#allocation12 + $0x50] sm:$0xff]  ;;  %v384_v55 = vld [vmem:[#allocation12 + $0x40] sm:$0xff]  ;;  %v383_v58 = vld [vmem:[#allocation12 + $0x38] sm:$0xff]  ;;  %530 = vmatpush.msra.mxu3 %v491_v57 }
  0x55   :  { %433 = vmatpush.msra.mxu0 %v404_v20  ;;  %v411_v59 = vld [vmem:[#allocation13 + $0x98] sm:$0xff]  ;;  %v382_v61 = vld [vmem:[#allocation12 + $0x30] sm:$0xff]  ;;  %v409_v62 = vld [vmem:[#allocation13 + $0x88] sm:$0xff] }
  0x56   :  { %511 = vmatpush.msra.mxu2 %v482_v21  ;;  %v489_v60 = vld [vmem:[#allocation15 + $0x98] sm:$0xff]  ;;  %v487_v63 = vld [vmem:[#allocation15 + $0x88] sm:$0xff]  ;;  %453 = vmatpush.msra.mxu1 %v411_v59  ;;  %v380_v3 = vld [vmem:[#allocation12 + $0x20] sm:$0xff] }
  0x57   :  { %434 = vmatpush.msra.mxu0 %v402_v22  ;;  %v381_v0 = vld [vmem:[#allocation12 + $0x28] sm:$0xff]  ;;  %531 = vmatpush.msra.mxu3 %v489_v60  ;;  %v407_v1 = vld [vmem:[#allocation13 + $0x78] sm:$0xff]  ;;  %v378_v9 = vld [vmem:[#allocation12 + $0x10] sm:$0xff] }
  0x58   :  { %512 = vmatpush.msra.mxu2 %v480_v23  ;;  %v485_v2 = vld [vmem:[#allocation15 + $0x78] sm:$0xff]  ;;  %454 = vmatpush.msra.mxu1 %v409_v62  ;;  %v405_v4 = vld [vmem:[#allocation13 + $0x68] sm:$0xff]  ;;  %v376_v15 = vld [vmem:[#allocation12] sm:$0xff] }
  0x59   :  { %435 = vmatpush.msra.mxu0 %v400_v24  ;;  %532 = vmatpush.msra.mxu3 %v487_v63  ;;  %v483_v5 = vld [vmem:[#allocation15 + $0x68] sm:$0xff]  ;;  %v379_v6 = vld [vmem:[#allocation12 + $0x18] sm:$0xff]  ;;  %v607_v24 = vld [vmem:[#allocation16 + $0x70] sm:$0xff] }
  0x5a   :  { %513 = vmatpush.msra.mxu2 %v478_v25  ;;  %455 = vmatpush.msra.mxu1 %v407_v1  ;;  %v403_v7 = vld [vmem:[#allocation13 + $0x58] sm:$0xff]  ;;  %v401_v10 = vld [vmem:[#allocation13 + $0x48] sm:$0xff]  ;;  %v593_v39 = vld [vmem:[#allocation16] sm:$0xff] }
  0x5b   :  { %436 = vmatpush.msra.mxu0 %v398_v26  ;;  %533 = vmatpush.msra.mxu3 %v485_v2  ;;  %v481_v8 = vld [vmem:[#allocation15 + $0x58] sm:$0xff]  ;;  %v479_v11 = vld [vmem:[#allocation15 + $0x48] sm:$0xff] }
  0x5c   :  { %514 = vmatpush.msra.mxu2 %v476_v27  ;;  %456 = vmatpush.msra.mxu1 %v405_v4  ;;  %v377_v12 = vld [vmem:[#allocation12 + $0x8] sm:$0xff]  ;;  %v399_v13 = vld [vmem:[#allocation13 + $0x38] sm:$0xff]  ;;  %v605_v27 = vld [vmem:[#allocation16 + $0x60] sm:$0xff] }
  0x5d   :  { %437 = vmatpush.msra.mxu0 %v396_v28  ;;  %534 = vmatpush.msra.mxu3 %v483_v5  ;;  %v477_v14 = vld [vmem:[#allocation15 + $0x38] sm:$0xff]  ;;  %v370_v16 = vld [vmem:[%s1411_s26] sm:$0xff] }
  0x5e   :  { %515 = vmatpush.msra.mxu2 %v474_v29  ;;  %457 = vmatpush.msra.mxu1 %v403_v7  ;;  %v371_v17 = vld [vmem:[%s1411_s26 + $0x8] sm:$0xff]  ;;  %v397_v18 = vld [vmem:[#allocation13 + $0x28] sm:$0xff] }
  0x5f   :  { %438 = vmatpush.msra.mxu0 %v394_v30  ;;  %535 = vmatpush.msra.mxu3 %v481_v8  ;;  %v475_v19 = vld [vmem:[#allocation15 + $0x28] sm:$0xff]  ;;  %v395_v20 = vld [vmem:[#allocation13 + $0x18] sm:$0xff]  ;;  %v603_v29 = vld [vmem:[#allocation16 + $0x50] sm:$0xff] }
  0x60   :  { %516 = vmatpush.msra.mxu2 %v472_v31  ;;  %458 = vmatpush.msra.mxu1 %v401_v10  ;;  %v473_v21 = vld [vmem:[#allocation15 + $0x18] sm:$0xff]  ;;  %v393_v22 = vld [vmem:[#allocation13 + $0x8] sm:$0xff]  ;;  %v601_v31 = vld [vmem:[#allocation16 + $0x40] sm:$0xff] }
  0x61   :  { %439 = vmatpush.msra.mxu0 %v392_v32  ;;  %536 = vmatpush.msra.mxu3 %v479_v11  ;;  %v608_v23 = vld [vmem:[#allocation16 + $0x78] sm:$0xff]  ;;  %v606_v25 = vld [vmem:[#allocation16 + $0x68] sm:$0xff] }
  0x62   :  { %517 = vmatpush.msra.mxu2 %v470_v33  ;;  %440 = vmatmul.f32.vlgmr.msra.gmra.mxu0 %v1421_v35  ;;  %v471_v26 = vld [vmem:[#allocation15 + $0x8] sm:$0xff]  ;;  %v604_v28 = vld [vmem:[#allocation16 + $0x58] sm:$0xff]  ;;  %v599_v33 = vld [vmem:[#allocation16 + $0x30] sm:$0xff] }
  0x63   :  { %548 = vmatpush.msrb.mxu0 %v391_v34  ;;  %518 = vmatmul.f32.vlgmr.msra.gmra.mxu2 %v1423_v36  ;;  %v602_v30 = vld [vmem:[#allocation16 + $0x48] sm:$0xff]  ;;  %v600_v32 = vld [vmem:[#allocation16 + $0x38] sm:$0xff] }
  0x64   :  { %959 = vmatpush.msrb.mxu2 %v391_v34  ;;  %459 = vmatpush.msra.mxu1 %v399_v13  ;;  %v598_v34 = vld [vmem:[#allocation16 + $0x28] sm:$0xff]  ;;  %v610_v45 = vld [vmem:[%s1416_s30 + $0x8] sm:$0xff] }
  0x65   :  { %549 = vmatpush.msrb.mxu0 %v390_v37  ;;  %537 = vmatpush.msra.mxu3 %v477_v14  ;;  %v594_v38 = vld [vmem:[#allocation16 + $0x8] sm:$0xff]  ;;  %v1474_v41 = vld [vmem:[#allocation18 + $0x38] sm:$0xff] }
  0x66   :  { %960 = vmatpush.msrb.mxu2 %v390_v37  ;;  %460 = vmatpush.msra.mxu1 %v397_v18  ;;  %v595_v37 = vld [vmem:[#allocation16 + $0x10] sm:$0xff]  ;;  %v1026_v53 = vld [vmem:[%s1531_s10] ss:$0 sm:$0xff] }
  0x67   :  { %550 = vmatpush.msrb.mxu0 %v389_v40  ;;  %538 = vmatpush.msra.mxu3 %v475_v19  ;;  %v609_v42 = vld [vmem:[%s1416_s30] sm:$0xff] }
  0x68   :  { %961 = vmatpush.msrb.mxu2 %v389_v40  ;;  %461 = vmatpush.msra.mxu1 %v395_v20 }
  0x69   :  { %551 = vmatpush.msrb.mxu0 %v388_v43  ;;  %539 = vmatpush.msra.mxu3 %v473_v21  ;;  %v648_v21 = vld [vmem:[#allocation2] sm:$0x1] }
  0x6a   :  { %962 = vmatpush.msrb.mxu2 %v388_v43  ;;  %443 = vmatmul.f32.gmra.mxu0 %v1427_v47  ;;  %v937_v43 = vadd.f32 -1.0, %v609_v42  ;;  %v1476_v42 = vld [vmem:[#allocation18 + $0x40] sm:$0xff] }
  0x6b   :  { %552 = vmatpush.msrb.mxu0 %v387_v46  ;;  %521 = vmatmul.f32.gmra.mxu2 %v1429_v48 }
  0x6c   :  { %963 = vmatpush.msrb.mxu2 %v387_v46  ;;  %462 = vmatpush.msra.mxu1 %v393_v22  ;;  %v613_v44 = vmul.f32 1e+30, %v937_v43  ;;  %v938_v46 = vadd.f32 -1.0, %v610_v45  ;;  %v680_v43 = vld [vmem:[#allocation18 + $0x48] sm:$0xff]  ;;  %v682_v45 = vld [vmem:[#allocation18 + $0x58] sm:$0xff] }
  0x6d   :  { %553 = vmatpush.msrb.mxu0 %v386_v49  ;;  %463 = vmatmul.f32.vlgmr.msra.gmra.mxu1 %v1421_v35  ;;  %v597_v35 = vld [vmem:[#allocation16 + $0x20] sm:$0xff] }
  0x6e   :  { %964 = vmatpush.msrb.mxu2 %v386_v49  ;;  %625 = vmatpush.msrb.mxu1 %v608_v23 }
  0x6f   :  { %554 = vmatpush.msrb.mxu0 %v385_v52  ;;  %540 = vmatpush.msra.mxu3 %v471_v26 }
  0x70   :  { %965 = vmatpush.msrb.mxu2 %v385_v52  ;;  %626 = vmatpush.msrb.mxu1 %v607_v24 }
  0x71   :  { %555 = vmatpush.msrb.mxu0 %v384_v55  ;;  %975 = vmatpush.msrb.mxu3 %v608_v23 }
  0x72   :  { %966 = vmatpush.msrb.mxu2 %v384_v55  ;;  %627 = vmatpush.msrb.mxu1 %v606_v25 }
  0x73   :  { %556 = vmatpush.msrb.mxu0 %v383_v58  ;;  %541 = vmatmul.f32.vlgmr.msra.gmra.mxu3 %v1423_v36  ;;  %v596_v36 = vld [vmem:[#allocation16 + $0x18] sm:$0xff] }
  0x74   :  { %967 = vmatpush.msrb.mxu2 %v383_v58  ;;  %628 = vmatpush.msrb.mxu1 %v605_v27 }
  0x75   :  { %557 = vmatpush.msrb.mxu0 %v382_v61  ;;  %466 = vmatmul.f32.gmra.mxu1 %v1427_v47 }
  0x76   :  { %968 = vmatpush.msrb.mxu2 %v382_v61  ;;  %629 = vmatpush.msrb.mxu1 %v604_v28 }
  0x77   :  { %558 = vmatpush.msrb.mxu0 %v381_v0  ;;  %976 = vmatpush.msrb.mxu3 %v607_v24  ;;  %v1253_v24 = vmov 0.0  }
  0x78   :  { %969 = vmatpush.msrb.mxu2 %v381_v0  ;;  %630 = vmatpush.msrb.mxu1 %v603_v29  ;;  %v1027_v0 = vld [vmem:[%s1532_s11] ss:$0 sm:$0xff] }
  0x79   :  { %559 = vmatpush.msrb.mxu0 %v380_v3  ;;  %977 = vmatpush.msrb.mxu3 %v606_v25 }
  0x7a   :  { %970 = vmatpush.msrb.mxu2 %v380_v3  ;;  %631 = vmatpush.msrb.mxu1 %v602_v30 }
  0x7b   :  { %560 = vmatpush.msrb.mxu0 %v379_v6  ;;  %978 = vmatpush.msrb.mxu3 %v605_v27 }
  0x7c   :  { %971 = vmatpush.msrb.mxu2 %v379_v6  ;;  %632 = vmatpush.msrb.mxu1 %v601_v31 }
  0x7d   :  { %561 = vmatpush.msrb.mxu0 %v378_v9  ;;  %979 = vmatpush.msrb.mxu3 %v604_v28 }
  0x7e   :  { %972 = vmatpush.msrb.mxu2 %v378_v9  ;;  %633 = vmatpush.msrb.mxu1 %v600_v32 }
  0x7f   :  { %562 = vmatpush.msrb.mxu0 %v377_v12  ;;  %544 = vmatmul.f32.gmra.mxu3 %v1429_v48  ;;  %v614_v48 = vmul.f32 1e+30, %v938_v46  ;;  %v683_v46 = vld [vmem:[#allocation18 + $0x60] sm:$0xff] }
  0x80   :  { %973 = vmatpush.msrb.mxu2 %v377_v12  ;;  %980 = vmatpush.msrb.mxu3 %v603_v29 }
  0x81   :  { %563 = vmatpush.msrb.mxu0 %v376_v15  ;;  %634 = vmatpush.msrb.mxu1 %v599_v33 }
  0x82   :  { %974 = vmatpush.msrb.mxu2 %v376_v15  ;;  %564 = vmatmul.f32.vlgmr.msrb.gmra.mxu0 %v370_v16 }
  0x83   :  { %567 = vmatmul.f32.vlgmr.msrb.gmra.mxu2 %v371_v17  ;;  %981 = vmatpush.msrb.mxu3 %v602_v30 }
  0x84   :  { %635 = vmatpush.msrb.mxu1 %v598_v34  ;;  %617 = vperm.xlu0 %1025, %v613_v44   ;;  %v681_v44 = vld [vmem:[#allocation18 + $0x50] sm:$0xff] }
  0x85   :  { %982 = vmatpush.msrb.mxu3 %v601_v31 }
  0x86   :  { %636 = vmatpush.msrb.mxu1 %v597_v35 }
  0x87   :  { %983 = vmatpush.msrb.mxu3 %v600_v32 }
  0x88   :  { %637 = vmatpush.msrb.mxu1 %v596_v36 }
  0x89   :  { %984 = vmatpush.msrb.mxu3 %v599_v33 }
  0x8a   :  { %638 = vmatpush.msrb.mxu1 %v595_v37 }
  0x8b   :  { %985 = vmatpush.msrb.mxu3 %v598_v34  ;;  %v1460_v34 = vld [vmem:[#allocation18] sm:$0xff] }
  0x8c   :  { %639 = vmatpush.msrb.mxu1 %v594_v38  ;;  %622 = vperm.xlu0 %1025, %v614_v48   ;;  %v685_v48 = vld [vmem:[#allocation18 + $0x70] sm:$0xff] }
  0x8d   :  { %986 = vmatpush.msrb.mxu3 %v597_v35  ;;  %v1462_v35 = vld [vmem:[#allocation18 + $0x8] sm:$0xff] }
  0x8e   :  { %640 = vmatpush.msrb.mxu1 %v593_v39 }
  0x8f   :  { %987 = vmatpush.msrb.mxu3 %v596_v36  ;;  %v1464_v36 = vld [vmem:[#allocation18 + $0x10] sm:$0xff] }
  0x91   :  { %988 = vmatpush.msrb.mxu3 %v595_v37  ;;  %v1466_v37 = vld [vmem:[#allocation18 + $0x18] sm:$0xff] }
  0x93   :  { %989 = vmatpush.msrb.mxu3 %v594_v38  ;;  %v1468_v38 = vld [vmem:[#allocation18 + $0x20] sm:$0xff] }
  0x95   :  { %990 = vmatpush.msrb.mxu3 %v593_v39  ;;  %v1470_v39 = vld [vmem:[#allocation18 + $0x28] sm:$0xff] }
  0xdf   :  { %v441_v40 = vpop.f32.mrf.mxu0 }
  0xe6   :  { %v519_v47 = vpop.f32.mrf.mxu2 }
  0xe7   :  { %v444_v49 = vpop.f32.mrf.mxu0 }
  0xea   :  { %v464_v1 = vpop.f32.mrf.mxu1 }
  0xee   :  { %v522_v50 = vpop.f32.mrf.mxu2 }
  0xf2   :  { %v467_v5 = vpop.f32.mrf.mxu1 }
  0xf6   :  { %v542_v2 = vpop.f32.mrf.mxu3  ;;  %v618_v9 = vpop.permute.xlu0 %617 }
  0xf7   :  { %v585_v3 = vadd.f32 %v542_v2, %v464_v1 }
  0xf9   :  { %v1447_v4 = vadd.f32 %v1027_v0, %v585_v3 }
  0xfe   :  { %v623_v11 = vpop.permute.xlu0 %622 }
  0xff   :  { %v565_v51 = vpop.f32.mrf.mxu0 }
 0x100   :  { %v566_v52 = vadd.f32 %v565_v51, %v441_v40  ;;  %v1472_v40 = vld [vmem:[#allocation18 + $0x30] sm:$0xff] }
 0x102   :  { %v571_v54 = vadd.f32 %v566_v52, %v519_v47  ;;  %v545_v6 = vpop.f32.mrf.mxu3  ;;  %v684_v47 = vld [vmem:[#allocation18 + $0x68] sm:$0xff] }
 0x103   :  { %v586_v7 = vadd.f32 %v545_v6, %v467_v5 }
 0x104   :  { %v577_v55 = vadd.f32 %v1026_v53, %v571_v54 }
 0x105   :  { %v1449_v8 = vadd.f32 %v1027_v0, %v586_v7 }
 0x106   :  { %v568_v56 = vpop.f32.mrf.mxu2  ;;  %vm579_vm0 = vcmp.ge.f32.partialorder %v577_v55, 0.0  ;;  %v581_v58 = vmul.f32 0.01, %v577_v55 }
 0x107   :  { %v569_v57 = vadd.f32 %v568_v56, %v444_v49  ;;  %v686_v49 = vld [vmem:[#allocation18 + $0x78] sm:$0xff] }
 0x108   :  { %v583_v60 = vsel %vm579_vm0, %v577_v55, %v581_v58 }
 0x109   :  { %v572_v59 = vadd.f32 %v569_v57, %v522_v50  ;;  %641 = vmatmul.f32.vlgmr.msrb.gmra.mxu1 %v583_v60 }
 0x10b   :  { %v578_v61 = vadd.f32 %v1026_v53, %v572_v59 }
 0x10d   :  { %vm580_vm1 = vcmp.ge.f32.partialorder %v578_v61, 0.0  ;;  %v582_v62 = vmul.f32 0.01, %v578_v61 }
 0x10f   :  { %v584_v63 = vsel %vm580_vm1, %v578_v61, %v582_v62 }
 0x110   :  { %644 = vmatmul.f32.vlgmr.msrb.gmra.mxu3 %v584_v63 }
 0x186   :  { %v642_v10 = vpop.f32.mrf.mxu1 }
 0x187   :  { %v1451_v13 = vadd.f32 %v642_v10, %v618_v9 }
 0x193   :  { %v645_v12 = vpop.f32.mrf.mxu3 }
 0x194   :  { %v1453_v14 = vadd.f32 %v645_v12, %v623_v11 }
 0x196   :  { %v649_v15 = vmax.f32 %v1451_v13, %v1453_v14 }
 0x198   :  { %v650_v16 = vrot.slane %v649_v15, 4 }
 0x19a   :  { %v651_v17 = vmax.f32 %v649_v15, %v650_v16 }
 0x19c   :  { %v652_v18 = vrot.slane %v651_v17, 2 }
 0x19e   :  { %v653_v19 = vmax.f32 %v651_v17, %v652_v18 }
 0x1a0   :  { %v654_v20 = vrot.slane %v653_v19, 1 }
 0x1a2   :  { %v655_v22 = vmax.f32 %v653_v19, %v654_v20 }
 0x1a4   :  { %vm657_vm3 = vcmp.gt.f32.partialorder %v655_v22, %v648_v21  ;;  %v1457_v23 = vmax.f32 %v648_v21, %v655_v22 }
 0x1a5   :  { %v658_v25 = vsel %vm657_vm3, 1.0, %v1253_v24 }
 0x1a6   :  { %v660_v26 = vsel %vm659_vm2, %v658_v25, -inf }
 0x1a7   :  { %661 = vmax.xlane.f32.xlu1 %v660_v26 }
 0x21a   :  { %v662_v27 = vpop.xlane.xlu1 %661 }
 0x21b   :  { %v663_v28 = vrot.slane %v662_v27, 4 }
 0x21d   :  { %v664_v29 = vmax.f32 %v662_v27, %v663_v28 }
 0x21f   :  { %v665_v30 = vrot.slane %v664_v29, 2 }
 0x221   :  { %v666_v31 = vmax.f32 %v664_v29, %v665_v30 }
 0x223   :  { %v667_v32 = vrot.slane %v666_v31, 1 }
 0x225   :  { %v668_v33 = vmax.f32 %v666_v31, %v667_v32 }
 0x227   :  { %1007 = vpush %v668_v33 }
 0x258   :  { %s1008_s10 = spop %1007 }
 0x259   :  { %p670_p0 = scmp.gt.f32.partialorder %s1008_s10, 0.0 }
 0x25a   :  { %696 = vmatpush.msra.mxu0 (%p670_p0), %v686_v49  ;;  %v690_v50 = vsub.f32 (%p670_p0), %v648_v21, %v1457_v23  ;;  %v717_v53 = vld [vmem:[#allocation3 + $0x8] sm:$0xff] (%p670_p0)  ;;  %v716_v57 = vld [vmem:[#allocation3] sm:$0xff] (%p670_p0) }
 0x25b   :  { %689 = sbr.rel (!%p670_p0) target bundleno = 764 (0x2fc), region = 89 }
 0x25c   :  { %697 = vmatpush.msra.mxu0 (%p670_p0), %v685_v48  ;;  %v691_v51 = vmul.f32 (%p670_p0), 1.442695, %v690_v50 }
 0x25e   :  { %698 = vmatpush.msra.mxu0 (%p670_p0), %v684_v47  ;;  %1028 = vpow2.f32 (%p670_p0), %v691_v51 }
 0x260   :  { %699 = vmatpush.msra.mxu0 %v683_v46 }
 0x262   :  { %700 = vmatpush.msra.mxu0 %v682_v45 }
 0x264   :  { %v1029_v52 = vpop.eup %1028  ;;  %701 = vmatpush.msra.mxu0 %v681_v44 }
 0x265   :  { %v694_v54 = vperm.slane %v1029_v52, 0 }
 0x266   :  { %702 = vmatpush.msra.mxu0 %v680_v43 }
 0x267   :  { %v721_v55 = vmul.f32 %v717_v53, %v694_v54 }
 0x268   :  { %703 = vmatpush.msra.mxu0 %v1476_v42 }
 0x269   :  { %723 = vst [vmem:[#allocation3 + $0x8] sm:$0xff] %v721_v55 }
 0x26a   :  { %704 = vmatpush.msra.mxu0 %v1474_v41 }
 0x26c   :  { %705 = vmatpush.msra.mxu0 %v1472_v40 }
 0x26e   :  { %706 = vmatpush.msra.mxu0 %v1470_v39 }
 0x270   :  { %707 = vmatpush.msra.mxu0 %v1468_v38 }
 0x272   :  { %708 = vmatpush.msra.mxu0 %v1466_v37 }
 0x274   :  { %709 = vmatpush.msra.mxu0 %v1464_v36 }
 0x276   :  { %710 = vmatpush.msra.mxu0 %v1462_v35 }
 0x278   :  { %711 = vmatpush.msra.mxu0 %v1460_v34 }
 0x279   :  { %712 = vmatmul.f32.vlgmr.msra.gmra.mxu0 %v694_v54 }
 0x2f6   :  { %v713_v56 = vpop.f32.mrf.mxu0 }
 0x2f7   :  { %v718_v58 = vperm.slane %v713_v56, 0 }
 0x2f9   :  { %v720_v59 = vmul.f32 %v718_v58, %v716_v57 }
 0x2fb   :  { %722 = vst [vmem:[#allocation3] sm:$0xff] %v720_v59 }
 0x2fc PF:  { %991 = vmatpush.msra.mxu3 %v686_v49  ;;  %724 = vst [vmem:[#allocation2] sm:$0x1] %v1457_v23  ;;  %734 = vmatpush.msra.mxu0 %v686_v49  ;;  %v726_v60 = vperm.slane %v1457_v23, 0  ;;  %v758_v3 = vlaneseq  ;;  %v1030_v6 = vld [vmem:[%s327_s12] ss:$0 sm:$0xff]  ;;  %vm771_vm5 = vcmask 130048  }
 0x2fe   :  { %992 = vmatpush.msra.mxu3 %v685_v48  ;;  %735 = vmatpush.msra.mxu0 %v685_v48  ;;  %v729_v61 = vsub.f32 %v1453_v14, %v726_v60  ;;  %v728_v62 = vsub.f32 %v1451_v13, %v726_v60  ;;  %v759_v5 = vshrl.u32 %v758_v3, 7  ;;  %v770_v13 = vld [vmem:[#allocation3 + $0x8] sm:$0xff] }
 0x300   :  { %993 = vmatpush.msra.mxu3 %v684_v47  ;;  %736 = vmatpush.msra.mxu0 %v684_v47  ;;  %v732_v63 = vmul.f32 1.442695, %v729_v61  ;;  %v730_v0 = vmul.f32 1.442695, %v728_v62  ;;  %vm764_vm4 = vcmp.eq.s32.totalorder %v759_v5, %v1030_v6 }
 0x301   :  { %v939_v7 = vsel %vm764_vm4, 1.0, %v1253_v24 }
 0x302   :  { %994 = vmatpush.msra.mxu3 %v683_v46  ;;  %737 = vmatpush.msra.mxu0 %v683_v46  ;;  %1031 = vpow2.f32 %v732_v63  ;;  %v769_v16 = vld [vmem:[#allocation3] sm:$0xff] }
 0x303   :  { %1033 = vpow2.f32 %v730_v0 }
 0x304   :  { %995 = vmatpush.msra.mxu3 %v682_v45  ;;  %738 = vmatpush.msra.mxu0 %v682_v45 }
 0x306   :  { %996 = vmatpush.msra.mxu3 %v681_v44  ;;  %739 = vmatpush.msra.mxu0 %v681_v44 }
 0x308   :  { %v1032_v1 = vpop.eup %1031  ;;  %997 = vmatpush.msra.mxu3 %v680_v43  ;;  %740 = vmatpush.msra.mxu0 %v680_v43 }
 0x309   :  { %809 = vmatpush.msra.mxu2 %v1032_v1  ;;  %v1034_v2 = vpop.eup %1033 }
 0x30a   :  { %998 = vmatpush.msra.mxu3 %v1476_v42  ;;  %741 = vmatpush.msra.mxu0 %v1476_v42 }
 0x30b   :  { %810 = vmatpush.msra.mxu2 %v1034_v2 }
 0x30c   :  { %999 = vmatpush.msra.mxu3 %v1474_v41  ;;  %742 = vmatpush.msra.mxu0 %v1474_v41 }
 0x30d   :  { %941 = vmatmul.msk.f32.vlgmr.msra.gmra.mxu2 %vm771_vm5, %v939_v7 }
 0x30e   :  { %1000 = vmatpush.msra.mxu3 %v1472_v40  ;;  %743 = vmatpush.msra.mxu0 %v1472_v40 }
 0x310   :  { %1001 = vmatpush.msra.mxu3 %v1470_v39  ;;  %744 = vmatpush.msra.mxu0 %v1470_v39 }
 0x312   :  { %1002 = vmatpush.msra.mxu3 %v1468_v38  ;;  %745 = vmatpush.msra.mxu0 %v1468_v38 }
 0x314   :  { %1003 = vmatpush.msra.mxu3 %v1466_v37  ;;  %746 = vmatpush.msra.mxu0 %v1466_v37 }
 0x316   :  { %1004 = vmatpush.msra.mxu3 %v1464_v36  ;;  %747 = vmatpush.msra.mxu0 %v1464_v36 }
 0x318   :  { %1005 = vmatpush.msra.mxu3 %v1462_v35  ;;  %748 = vmatpush.msra.mxu0 %v1462_v35 }
 0x31a   :  { %1006 = vmatpush.msra.mxu3 %v1460_v34  ;;  %749 = vmatpush.msra.mxu0 %v1460_v34 }
 0x31b   :  { %753 = vmatmul.f32.vlgmr.msra.gmra.mxu3 %v1032_v1  ;;  %750 = vmatmul.f32.vlgmr.msra.gmra.mxu0 %v1034_v2 }
 0x390   :  { %v812_v14 = vpop.f32.mrf.mxu2 }
 0x391   :  { %v816_v15 = vadd.f32 %v812_v14, %v770_v13 }
 0x393   :  { %818 = vst [vmem:[#allocation3 + $0x8] sm:$0xff] %v816_v15 }
 0x398   :  { %v751_v9 = vpop.f32.mrf.mxu0 }
 0x399   :  { %v767_v12 = vmul.f32 %v751_v9, %v1447_v4 }
 0x39e   :  { %v754_v10 = vpop.f32.mrf.mxu3 }
 0x39f   :  { %v768_v11 = vmul.f32 %v754_v10, %v1449_v8 }
 0x3a1   :  { %789 = vmatpush.msra.mxu1 %v768_v11 }
 0x3a3   :  { %790 = vmatpush.msra.mxu1 %v767_v12 }
 0x3a4   :  { %940 = vmatmul.msk.f32.vlgmr.msra.gmra.mxu1 %vm771_vm5, %v939_v7 }
 0x421   :  { %v792_v17 = vpop.f32.mrf.mxu1 }
 0x422   :  { %v815_v18 = vadd.f32 %v792_v17, %v769_v16 }
 0x424   :  { %817 = vst [vmem:[#allocation3] sm:$0xff] %v815_v18 }
 0x425 PF:  { %v839_v19 = vld [vmem:[#allocation18 + $0x78] sm:$0xff]  ;;  %v838_v20 = vld [vmem:[#allocation18 + $0x70] sm:$0xff]  ;;  %v837_v21 = vld [vmem:[#allocation18 + $0x68] sm:$0xff]  ;;  %s1254_s5 = smov [#allocation19]   ;;  %s1537_s3 = sld [smem:[#allocation25_spill]] }
 0x426   :  { %840 = vmatpush.msra.mxu0 %v839_v19  ;;  %v836_v8 = vld [vmem:[#allocation18 + $0x60] sm:$0xff]  ;;  %v835_v4 = vld [vmem:[#allocation18 + $0x58] sm:$0xff]  ;;  %v834_v22 = vld [vmem:[#allocation18 + $0x50] sm:$0xff]  ;;  %s881_s23 = sshll.u32 %s1254_s5, 4  ;;  %s882_s23 = int_to_ptr.vmem [resolvable:$true] %s881_s23 }
 0x427   :  { %v833_v23 = vld [vmem:[#allocation18 + $0x48] sm:$0xff]  ;;  %v832_v24 = vld [vmem:[#allocation18 + $0x40] sm:$0xff]  ;;  %v831_v25 = vld [vmem:[#allocation18 + $0x38] sm:$0xff] }
 0x428   :  { %841 = vmatpush.msra.mxu0 %v838_v20  ;;  %v830_v26 = vld [vmem:[#allocation18 + $0x30] sm:$0xff]  ;;  %v829_v27 = vld [vmem:[#allocation18 + $0x28] sm:$0xff]  ;;  %v828_v28 = vld [vmem:[#allocation18 + $0x20] sm:$0xff] }
 0x429   :  { %v827_v29 = vld [vmem:[#allocation18 + $0x18] sm:$0xff]  ;;  %v826_v30 = vld [vmem:[#allocation18 + $0x10] sm:$0xff]  ;;  %v825_v31 = vld [vmem:[#allocation18 + $0x8] sm:$0xff] }
 0x42a   :  { %842 = vmatpush.msra.mxu0 %v837_v21  ;;  %v824_v32 = vld [vmem:[#allocation18] sm:$0xff]  ;;  %v823_v33 = vld [vmem:[#allocation3 + $0x8] sm:$0xff] }
 0x42b   :  { %v822_v43 = vld [vmem:[#allocation3] sm:$0xff]  ;;  %s883_s0 = sshll.u32 %s1537_s3, 4  ;;  %s884_s0 = int_to_ptr.hbm [resolvable:$true] %s883_s0 }
 0x42c   :  { %843 = vmatpush.msra.mxu0 %v836_v8 }
 0x42e   :  { %844 = vmatpush.msra.mxu0 %v835_v4 }
 0x430   :  { %845 = vmatpush.msra.mxu0 %v834_v22 }
 0x432   :  { %846 = vmatpush.msra.mxu0 %v833_v23 }
 0x434   :  { %847 = vmatpush.msra.mxu0 %v832_v24 }
 0x436   :  { %848 = vmatpush.msra.mxu0 %v831_v25 }
 0x438   :  { %849 = vmatpush.msra.mxu0 %v830_v26 }
 0x43a   :  { %850 = vmatpush.msra.mxu0 %v829_v27 }
 0x43c   :  { %851 = vmatpush.msra.mxu0 %v828_v28 }
 0x43e   :  { %852 = vmatpush.msra.mxu0 %v827_v29 }
 0x440   :  { %853 = vmatpush.msra.mxu0 %v826_v30 }
 0x442   :  { %854 = vmatpush.msra.mxu0 %v825_v31 }
 0x444   :  { %855 = vmatpush.msra.mxu0 %v824_v32 }
 0x445   :  { %856 = vmatmul.f32.vlgmr.msra.gmra.mxu0 %v823_v33 }
 0x4c2   :  { %v857_v34 = vpop.f32.mrf.mxu0 }
 0x4c3   :  { %v858_v35 = vadd.f32 1e-16, %v857_v34 }
 0x4c5   :  { %1035 = vrcp.f32 %v858_v35  ;;  %v871_v39 = vand.u32 2147483648, %v858_v35  ;;  %v869_v41 = vand.u32 2147483647, %v858_v35  ;;  %vm865_vm7 = vweird.f32 %v858_v35 }
 0x4c7   :  { %v872_v44 = vor.u32 1.1754944e-38, %v871_v39  ;;  %vm870_vm9 = vcmp.eq.f32.partialorder %v869_v41, 8.507059e+37 }
 0x4cb   :  { %v1036_v36 = vpop.eup %1035 }
 0x4cc   :  { %v861_v37 = vmul.f32 %v1036_v36, %v858_v35  ;;  %vm866_vm6 = vweird.f32 %v1036_v36 }
 0x4cd   :  { %vm867_vm8 = vmor %vm865_vm7, %vm866_vm6 }
 0x4ce   :  { %v862_v38 = vsub.f32 1.0, %v861_v37 }
 0x4d0   :  { %v863_v40 = vmul.f32 %v1036_v36, %v862_v38 }
 0x4d2   :  { %v864_v42 = vadd.f32 %v1036_v36, %v863_v40 }
 0x4d4   :  { %v868_v45 = vsel %vm867_vm8, %v1036_v36, %v864_v42 }
 0x4d5   :  { %v873_v46 = vsel %vm870_vm9, %v872_v44, %v868_v45 }
 0x4d6   :  { %v874_v47 = vmul.f32 %v873_v46, %v822_v43 }
 0x4d8   :  { %875 = vst [vmem:[#allocation19] sm:$0xff] %v874_v47 }
 0x4d9   :  { %886 = dma.vmem_to_hbm [thread:$0]  %s882_s23, 128, %s884_s0, [#allocation9]  }
 0x4da   :  { %1237 = dma.done.wait [#allocation9], 128  }
 0x4db   :  { %1238 = vsyncadd [#allocation9], 4294967168 }
 0x4dc   :  { %891 = vsyncpa [#allocation8], 1 }
 0x4dd   :  { %892 = vsyncpa [#allocation11], 1 }
 0x4de   :  { %893 = vsyncpa [#allocation14], 1 }
 0x4df   :  { %894 = vsyncpa [#allocation17], 1 }
 0x4e0   :  { %895 = vsyncpa [#allocation9], 1 }

</bundles_post_ra>
